<compile_context>
chip_gen: v6e
topology: v6e:2x2x1
jax: 0.10.0
libtpu: 0.0.40
codegen_flags: <defaults>
</compile_context>

<pallas_src>
import functools

import jax
import jax.numpy as jnp
from jax import lax
from jax.experimental import pallas as pl
from jax.experimental.pallas import tpu as pltpu


def _resblock_kernel(x_ref, w1_ref, b1_ref, w2_ref, b2_ref, o_ref,
                     slab_ref, patch_ref, *, H, W, C, Nb, LPAD, compute_dtype):
    HW = H * W

    # Zero the zero-halo staging slab once per grid step.  Only the lane-aligned
    # center window is ever overwritten below, so the halo stays zero for every
    # image and both convs of this step.
    slab_ref[...] = jnp.zeros_like(slab_ref)

    # Width-wrap masks (row-out-of-range taps already fall in the zero halo).
    # Built once per grid step from a (1, HW) iota, broadcast against (C, HW).
    col = lax.broadcasted_iota(jnp.int32, (1, HW), 1) % W
    mask_l = col > 0          # tap reads (w-1): invalid at w == 0
    mask_r = col < W - 1      # tap reads (w+1): invalid at w == W-1

    w1 = w1_ref[...]          # (C, 9C) compute_dtype
    w2 = w2_ref[...]
    b1 = b1_ref[...]          # (C, 1) f32
    b2 = b2_ref[...]

    def build_patches():
        # im2col: 9 static lane-offset slices of the compute_dtype staging slab
        # into the persistent (9C, HW) patch scratch (sublane-aligned row blocks,
        # dy-major / dx-minor to match the (C, 9C) weight layout).
        for dy in range(3):
            for dx in range(3):
                start = LPAD + (dy - 1) * W + (dx - 1)
                t = slab_ref[:, start:start + HW]             # (C, HW) compute_dtype
                if dx == 0:
                    t = jnp.where(mask_l, t, jnp.zeros_like(t))
                elif dx == 2:
                    t = jnp.where(mask_r, t, jnp.zeros_like(t))
                patch_ref[pl.ds((dy * 3 + dx) * C, C), :] = t

    def body(n, carry):
        x = x_ref[n]                                          # (C, HW) f32 residual
        # Stage conv1 input: single compute_dtype cast, lane-aligned center store.
        slab_ref[:, LPAD:LPAD + HW] = x.astype(compute_dtype)

        build_patches()
        y1 = jnp.dot(w1, patch_ref[...],
                     preferred_element_type=jnp.float32) + b1  # (C, HW) f32
        a1 = jnp.maximum(y1, 0.2 * y1)                         # LeakyReLU(0.2)

        # Stage conv2 input in the same slab (halo still zero).
        slab_ref[:, LPAD:LPAD + HW] = a1.astype(compute_dtype)
        build_patches()
        y2 = jnp.dot(w2, patch_ref[...],
                     preferred_element_type=jnp.float32) + b2

        o_ref[n] = (y2 * 0.2 + x).astype(o_ref.dtype)          # residual scale + add
        return carry

    # fori_loop (not a Python for) bounds vreg live ranges as Nb grows.
    lax.fori_loop(0, Nb, body, None, unroll=True)


def resblock_pallas(x_nchw, w1_hwio, b1, w2_hwio, b2, *,
                    batch_block=1, compute_dtype=jnp.bfloat16):
    """x_nchw: (N, C, H, W). Conv weights HWIO (3, 3, C, C), biases (C,)."""
    N, C, H, W = x_nchw.shape
    HW = H * W
    Nb = batch_block
    assert N % Nb == 0, "batch_block must divide N"

    # Lane-aligned zero-halo staging slab: left halo rounded up to 128 lanes,
    # total width rounded up to 128; both halos are >= W+1 so every conv tap is
    # a static lane slice with row-out-of-range taps landing in the zero halo.
    LPAD = ((W + 1 + 127) // 128) * 128
    HWPAD = ((LPAD + HW + W + 1 + 127) // 128) * 128

    # NCHW already has channels-on-sublanes / spatial-on-lanes once H,W are
    # flattened: reshape only — no transpose, no wrapper-side pad (no extra HBM pass).
    x_flat = x_nchw.reshape(N, C, HW)

    # HWIO (3,3,Cin,Cout) -> (Cout, 9*Cin) so each conv is one GEMM.  MXU operands
    # in compute_dtype (bf16 recommended), f32 accumulation in the kernel.
    def prep_w(w):
        return jnp.transpose(w, (3, 0, 1, 2)).reshape(C, 9 * C).astype(compute_dtype)

    w1m, w2m = prep_w(w1_hwio), prep_w(w2_hwio)
    b1c = b1.reshape(C, 1).astype(jnp.float32)
    b2c = b2.reshape(C, 1).astype(jnp.float32)

    kernel = functools.partial(_resblock_kernel, H=H, W=W, C=C, Nb=Nb,
                               LPAD=LPAD, compute_dtype=compute_dtype)

    out_flat = pl.pallas_call(
        kernel,
        out_shape=jax.ShapeDtypeStruct((N, C, HW), x_nchw.dtype),
        grid_spec=pltpu.PrefetchScalarGridSpec(
            num_scalar_prefetch=0,
            grid=(N // Nb,),
            in_specs=[
                pl.BlockSpec((Nb, C, HW), lambda b: (b, 0, 0)),
                pl.BlockSpec((C, 9 * C), lambda b: (0, 0)),
                pl.BlockSpec((C, 1), lambda b: (0, 0)),
                pl.BlockSpec((C, 9 * C), lambda b: (0, 0)),
                pl.BlockSpec((C, 1), lambda b: (0, 0)),
            ],
            out_specs=pl.BlockSpec((Nb, C, HW), lambda b: (b, 0, 0)),
            scratch_shapes=[
                pltpu.VMEM((C, HWPAD), compute_dtype),    # zero-halo staging slab
                pltpu.VMEM((9 * C, HW), compute_dtype),   # im2col patch matrix
            ],
        ),
        compiler_params=pltpu.CompilerParams(
            dimension_semantics=("parallel",)),
    )(x_flat, w1m, b1c, w2m, b2c)

    return out_flat.reshape(N, C, H, W)


def _reference(x_nchw, w1, b1, w2, b2):
    # Pure-JAX f32 reference using lax.conv (HWIO -> OIHW), highest precision.
    def conv(x, w_hwio, b):
        w_oihw = jnp.transpose(w_hwio, (3, 2, 0, 1))
        y = lax.conv_general_dilated(
            x, w_oihw, window_strides=(1, 1), padding="SAME",
            dimension_numbers=("NCHW", "OIHW", "NCHW"),
            precision=lax.Precision.HIGHEST)
        return y + b[None, :, None, None]

    out = conv(x_nchw, w1, b1)
    out = jnp.where(out >= 0, out, 0.2 * out)
    out = conv(out, w2, b2)
    return out * 0.2 + x_nchw


if __name__ == "__main__":
    key = jax.random.PRNGKey(0)
    k_x, k_w1, k_b1, k_w2, k_b2 = jax.random.split(key, 5)

    N, C, H, W = 2, 32, 16, 16
    kSize = 3

    x = jax.random.normal(k_x, (N, C, H, W), jnp.float32)
    # Deterministic init roughly matching PyTorch Conv2d default scale.
    fan_in = C * kSize * kSize
    bound = 1.0 / (fan_in ** 0.5)
    w1 = jax.random.uniform(k_w1, (kSize, kSize, C, C), jnp.float32, -bound, bound)
    b1 = jax.random.uniform(k_b1, (C,), jnp.float32, -bound, bound)
    w2 = jax.random.uniform(k_w2, (kSize, kSize, C, C), jnp.float32, -bound, bound)
    b2 = jax.random.uniform(k_b2, (C,), jnp.float32, -bound, bound)

    ref = _reference(x, w1, b1, w2, b2)

    # f32 MXU operands: tight check of the kernel structure / tap indexing.
    out_f32 = jax.block_until_ready(
        resblock_pallas(x, w1, b1, w2, b2, compute_dtype=jnp.float32))
    assert out_f32.shape == (N, C, H, W)
    assert jnp.allclose(out_f32, ref, atol=2e-3, rtol=2e-3), float(
        jnp.max(jnp.abs(out_f32 - ref)))

    # bf16 MXU operands (recommended fast path), f32 accumulation: looser check.
    out_bf16 = jax.block_until_ready(
        resblock_pallas(x, w1, b1, w2, b2, compute_dtype=jnp.bfloat16))
    assert out_bf16.shape == (N, C, H, W)
    assert jnp.allclose(out_bf16, ref, atol=2e-2, rtol=2e-2), float(
        jnp.max(jnp.abs(out_bf16 - ref)))

    print("KERNEL_OK")
</pallas_src>

<mosaic_0001>
module attributes {stable_mosaic.version = 11 : i64} {
  func.func @_resblock_kernel(%arg0: i32, %arg1: memref<1x32x256xf32, #tpu.memory_space<vmem>>, %arg2: memref<32x288xf32, #tpu.memory_space<vmem>>, %arg3: memref<32x1xf32, #tpu.memory_space<vmem>>, %arg4: memref<32x288xf32, #tpu.memory_space<vmem>>, %arg5: memref<32x1xf32, #tpu.memory_space<vmem>>, %arg6: memref<1x32x256xf32, #tpu.memory_space<vmem>>, %arg7: memref<32x512xf32, #tpu.memory_space<vmem>>, %arg8: memref<288x256xf32, #tpu.memory_space<vmem>>) attributes {dimension_semantics = [#tpu.dimension_semantics<parallel>], iteration_bounds = array<i64: 2>, scalar_prefetch = 0 : i64, scratch_operands = 2 : i64, tpu.core_type = #tpu.core_type<tc>, window_params = [{transform_indices = @transform_0, window_bounds = array<i64: 1, 32, 256>}, {pipeline_mode = #tpu.pipeline_mode<synchronous>, transform_indices = @transform_1, window_bounds = array<i64: 32, 288>}, {pipeline_mode = #tpu.pipeline_mode<synchronous>, transform_indices = @transform_2, window_bounds = array<i64: 32, 1>}, {pipeline_mode = #tpu.pipeline_mode<synchronous>, transform_indices = @transform_3, window_bounds = array<i64: 32, 288>}, {pipeline_mode = #tpu.pipeline_mode<synchronous>, transform_indices = @transform_4, window_bounds = array<i64: 32, 1>}, {transform_indices = @transform_5, window_bounds = array<i64: 1, 32, 256>}]} {
    %cst = arith.constant 0.000000e+00 : f32
    %0 = vector.broadcast %cst : f32 to vector<32x512xf32>
    %c0 = arith.constant 0 : index
    %c0_0 = arith.constant 0 : index
    %1 = vector.load %arg7[%c0, %c0_0] : memref<32x512xf32, #tpu.memory_space<vmem>>, vector<32x512xf32>
    tpu.vector_store %arg7[%c0, %c0_0], %0 {strides = array<i32>} : memref<32x512xf32, #tpu.memory_space<vmem>>, vector<32x512xf32>,
    %2 = tpu.iota {dimensions = array<i32: 1>} : vector<1x256xi32>
    %c16_i32 = arith.constant 16 : i32
    %c0_i32 = arith.constant 0 : i32
    %3 = arith.cmpi eq, %c16_i32, %c0_i32 : i32
    %c1_i32 = arith.constant 1 : i32
    %4 = arith.select %3, %c1_i32, %c16_i32 : i32
    %5 = vector.broadcast %4 : i32 to vector<1x256xi32>
    %6 = arith.remsi %2, %5 : vector<1x256xi32>
    %c0_i32_1 = arith.constant 0 : i32
    %7 = vector.broadcast %c0_i32_1 : i32 to vector<1x256xi32>
    %8 = arith.cmpi ne, %6, %7 : vector<1x256xi32>
    %c0_i32_2 = arith.constant 0 : i32
    %9 = vector.broadcast %c0_i32_2 : i32 to vector<1x256xi32>
    %10 = arith.cmpi slt, %6, %9 : vector<1x256xi32>
    %c0_i32_3 = arith.constant 0 : i32
    %11 = arith.cmpi slt, %4, %c0_i32_3 : i32
    %12 = vector.broadcast %11 : i1 to vector<1x256xi1>
    %13 = vector.broadcast %12 : vector<1x256xi1> to vector<1x256xi1>
    %14 = arith.xori %10, %13 : vector<1x256xi1>
    %15 = arith.andi %14, %8 : vector<1x256xi1>
    %16 = vector.broadcast %4 : i32 to vector<1x256xi32>
    %17 = arith.addi %6, %16 : vector<1x256xi32>
    %18 = arith.select %15, %17, %6 : vector<1x256xi1>, vector<1x256xi32>
    %c0_i32_4 = arith.constant 0 : i32
    %19 = vector.broadcast %c0_i32_4 : i32 to vector<1x256xi32>
    %20 = arith.cmpi sgt, %18, %19 : vector<1x256xi32>
    %c15_i32 = arith.constant 15 : i32
    %21 = vector.broadcast %c15_i32 : i32 to vector<1x256xi32>
    %22 = arith.cmpi slt, %18, %21 : vector<1x256xi32>
    %c0_5 = arith.constant 0 : index
    %c0_6 = arith.constant 0 : index
    %23 = vector.load %arg2[%c0_5, %c0_6] : memref<32x288xf32, #tpu.memory_space<vmem>>, vector<32x288xf32>
    %c0_7 = arith.constant 0 : index
    %c0_8 = arith.constant 0 : index
    %24 = vector.load %arg4[%c0_7, %c0_8] : memref<32x288xf32, #tpu.memory_space<vmem>>, vector<32x288xf32>
    %c0_9 = arith.constant 0 : index
    %c0_10 = arith.constant 0 : index
    %25 = vector.load %arg3[%c0_9, %c0_10] : memref<32x1xf32, #tpu.memory_space<vmem>>, vector<32x1xf32>
    %c0_11 = arith.constant 0 : index
    %c0_12 = arith.constant 0 : index
    %26 = vector.load %arg5[%c0_11, %c0_12] : memref<32x1xf32, #tpu.memory_space<vmem>>, vector<32x1xf32>
    %c0_i32_13 = arith.constant 0 : i32
    %27 = arith.index_cast %c0_i32_13 : i32 to index
    %c0_14 = arith.constant 0 : index
    %c0_15 = arith.constant 0 : index
    %28 = vector.load %arg1[%27, %c0_14, %c0_15] : memref<1x32x256xf32, #tpu.memory_space<vmem>>, vector<1x32x256xf32>
    %29 = vector.shape_cast %28 : vector<1x32x256xf32> to vector<32x256xf32>
    %c0_16 = arith.constant 0 : index
    %c128 = arith.constant 128 : index
    %30 = vector.load %arg7[%c0_16, %c128] : memref<32x512xf32, #tpu.memory_space<vmem>>, vector<32x256xf32>
    tpu.vector_store %arg7[%c0_16, %c128], %29 {strides = array<i32>} : memref<32x512xf32, #tpu.memory_space<vmem>>, vector<32x256xf32>,
    %c0_17 = arith.constant 0 : index
    %c111 = arith.constant 111 : index
    %31 = vector.load %arg7[%c0_17, %c111] : memref<32x512xf32, #tpu.memory_space<vmem>>, vector<32x256xf32>
    %cst_18 = arith.constant 0.000000e+00 : f32
    %32 = vector.broadcast %cst_18 : f32 to vector<32x256xf32>
    %33 = vector.shape_cast %20 : vector<1x256xi1> to vector<1x256xi1>
    %34 = vector.broadcast %33 : vector<1x256xi1> to vector<32x256xi1>
    %35 = arith.select %34, %31, %32 : vector<32x256xi1>, vector<32x256xf32>
    %c0_19 = arith.constant 0 : index
    %c0_20 = arith.constant 0 : index
    %36 = vector.load %arg8[%c0_19, %c0_20] : memref<288x256xf32, #tpu.memory_space<vmem>>, vector<32x256xf32>
    tpu.vector_store %arg8[%c0_19, %c0_20], %35 {strides = array<i32>} : memref<288x256xf32, #tpu.memory_space<vmem>>, vector<32x256xf32>,
    %c0_21 = arith.constant 0 : index
    %c112 = arith.constant 112 : index
    %37 = vector.load %arg7[%c0_21, %c112] : memref<32x512xf32, #tpu.memory_space<vmem>>, vector<32x256xf32>
    %c32 = arith.constant 32 : index
    %c0_22 = arith.constant 0 : index
    %38 = vector.load %arg8[%c32, %c0_22] : memref<288x256xf32, #tpu.memory_space<vmem>>, vector<32x256xf32>
    tpu.vector_store %arg8[%c32, %c0_22], %37 {strides = array<i32>} : memref<288x256xf32, #tpu.memory_space<vmem>>, vector<32x256xf32>,
    %c0_23 = arith.constant 0 : index
    %c113 = arith.constant 113 : index
    %39 = vector.load %arg7[%c0_23, %c113] : memref<32x512xf32, #tpu.memory_space<vmem>>, vector<32x256xf32>
    %cst_24 = arith.constant 0.000000e+00 : f32
    %40 = vector.broadcast %cst_24 : f32 to vector<32x256xf32>
    %41 = vector.shape_cast %22 : vector<1x256xi1> to vector<1x256xi1>
    %42 = vector.broadcast %41 : vector<1x256xi1> to vector<32x256xi1>
    %43 = arith.select %42, %39, %40 : vector<32x256xi1>, vector<32x256xf32>
    %c64 = arith.constant 64 : index
    %c0_25 = arith.constant 0 : index
    %44 = vector.load %arg8[%c64, %c0_25] : memref<288x256xf32, #tpu.memory_space<vmem>>, vector<32x256xf32>
    tpu.vector_store %arg8[%c64, %c0_25], %43 {strides = array<i32>} : memref<288x256xf32, #tpu.memory_space<vmem>>, vector<32x256xf32>,
    %c0_26 = arith.constant 0 : index
    %c127 = arith.constant 127 : index
    %45 = vector.load %arg7[%c0_26, %c127] : memref<32x512xf32, #tpu.memory_space<vmem>>, vector<32x256xf32>
    %cst_27 = arith.constant 0.000000e+00 : f32
    %46 = vector.broadcast %cst_27 : f32 to vector<32x256xf32>
    %47 = vector.shape_cast %20 : vector<1x256xi1> to vector<1x256xi1>
    %48 = vector.broadcast %47 : vector<1x256xi1> to vector<32x256xi1>
    %49 = arith.select %48, %45, %46 : vector<32x256xi1>, vector<32x256xf32>
    %c96 = arith.constant 96 : index
    %c0_28 = arith.constant 0 : index
    %50 = vector.load %arg8[%c96, %c0_28] : memref<288x256xf32, #tpu.memory_space<vmem>>, vector<32x256xf32>
    tpu.vector_store %arg8[%c96, %c0_28], %49 {strides = array<i32>} : memref<288x256xf32, #tpu.memory_space<vmem>>, vector<32x256xf32>,
    %c0_29 = arith.constant 0 : index
    %c128_30 = arith.constant 128 : index
    %51 = vector.load %arg7[%c0_29, %c128_30] : memref<32x512xf32, #tpu.memory_space<vmem>>, vector<32x256xf32>
    %c128_31 = arith.constant 128 : index
    %c0_32 = arith.constant 0 : index
    %52 = vector.load %arg8[%c128_31, %c0_32] : memref<288x256xf32, #tpu.memory_space<vmem>>, vector<32x256xf32>
    tpu.vector_store %arg8[%c128_31, %c0_32], %51 {strides = array<i32>} : memref<288x256xf32, #tpu.memory_space<vmem>>, vector<32x256xf32>,
    %c0_33 = arith.constant 0 : index
    %c129 = arith.constant 129 : index
    %53 = vector.load %arg7[%c0_33, %c129] : memref<32x512xf32, #tpu.memory_space<vmem>>, vector<32x256xf32>
    %cst_34 = arith.constant 0.000000e+00 : f32
    %54 = vector.broadcast %cst_34 : f32 to vector<32x256xf32>
    %55 = vector.shape_cast %22 : vector<1x256xi1> to vector<1x256xi1>
    %56 = vector.broadcast %55 : vector<1x256xi1> to vector<32x256xi1>
    %57 = arith.select %56, %53, %54 : vector<32x256xi1>, vector<32x256xf32>
    %c160 = arith.constant 160 : index
    %c0_35 = arith.constant 0 : index
    %58 = vector.load %arg8[%c160, %c0_35] : memref<288x256xf32, #tpu.memory_space<vmem>>, vector<32x256xf32>
    tpu.vector_store %arg8[%c160, %c0_35], %57 {strides = array<i32>} : memref<288x256xf32, #tpu.memory_space<vmem>>, vector<32x256xf32>,
    %c0_36 = arith.constant 0 : index
    %c143 = arith.constant 143 : index
    %59 = vector.load %arg7[%c0_36, %c143] : memref<32x512xf32, #tpu.memory_space<vmem>>, vector<32x256xf32>
    %cst_37 = arith.constant 0.000000e+00 : f32
    %60 = vector.broadcast %cst_37 : f32 to vector<32x256xf32>
    %61 = vector.shape_cast %20 : vector<1x256xi1> to vector<1x256xi1>
    %62 = vector.broadcast %61 : vector<1x256xi1> to vector<32x256xi1>
    %63 = arith.select %62, %59, %60 : vector<32x256xi1>, vector<32x256xf32>
    %c192 = arith.constant 192 : index
    %c0_38 = arith.constant 0 : index
    %64 = vector.load %arg8[%c192, %c0_38] : memref<288x256xf32, #tpu.memory_space<vmem>>, vector<32x256xf32>
    tpu.vector_store %arg8[%c192, %c0_38], %63 {strides = array<i32>} : memref<288x256xf32, #tpu.memory_space<vmem>>, vector<32x256xf32>,
    %c0_39 = arith.constant 0 : index
    %c144 = arith.constant 144 : index
    %65 = vector.load %arg7[%c0_39, %c144] : memref<32x512xf32, #tpu.memory_space<vmem>>, vector<32x256xf32>
    %c224 = arith.constant 224 : index
    %c0_40 = arith.constant 0 : index
    %66 = vector.load %arg8[%c224, %c0_40] : memref<288x256xf32, #tpu.memory_space<vmem>>, vector<32x256xf32>
    tpu.vector_store %arg8[%c224, %c0_40], %65 {strides = array<i32>} : memref<288x256xf32, #tpu.memory_space<vmem>>, vector<32x256xf32>,
    %c0_41 = arith.constant 0 : index
    %c145 = arith.constant 145 : index
    %67 = vector.load %arg7[%c0_41, %c145] : memref<32x512xf32, #tpu.memory_space<vmem>>, vector<32x256xf32>
    %cst_42 = arith.constant 0.000000e+00 : f32
    %68 = vector.broadcast %cst_42 : f32 to vector<32x256xf32>
    %69 = vector.shape_cast %22 : vector<1x256xi1> to vector<1x256xi1>
    %70 = vector.broadcast %69 : vector<1x256xi1> to vector<32x256xi1>
    %71 = arith.select %70, %67, %68 : vector<32x256xi1>, vector<32x256xf32>
    %c256 = arith.constant 256 : index
    %c0_43 = arith.constant 0 : index
    %72 = vector.load %arg8[%c256, %c0_43] : memref<288x256xf32, #tpu.memory_space<vmem>>, vector<32x256xf32>
    tpu.vector_store %arg8[%c256, %c0_43], %71 {strides = array<i32>} : memref<288x256xf32, #tpu.memory_space<vmem>>, vector<32x256xf32>,
    %c0_44 = arith.constant 0 : index
    %c0_45 = arith.constant 0 : index
    %73 = vector.load %arg8[%c0_44, %c0_45] : memref<288x256xf32, #tpu.memory_space<vmem>>, vector<288x256xf32>
    %cst_46 = arith.constant dense<0.000000e+00> : vector<32x256xf32>
    %74 = tpu.matmul %23, %73, %cst_46 {dimension_numbers = #tpu.dot_dimension_numbers<[1], [0], [0], [1], [0, 0, 1, 1], [], []>} : vector<32x288xf32>, vector<288x256xf32>, vector<32x256xf32> -> vector<32x256xf32>
    %75 = vector.broadcast %25 : vector<32x1xf32> to vector<32x256xf32>
    %76 = arith.addf %74, %75 : vector<32x256xf32>
    %cst_47 = arith.constant 2.000000e-01 : f32
    %77 = vector.broadcast %cst_47 : f32 to vector<32x256xf32>
    %78 = arith.mulf %77, %76 : vector<32x256xf32>
    %79 = arith.maximumf %76, %78 : vector<32x256xf32>
    %c0_48 = arith.constant 0 : index
    %c128_49 = arith.constant 128 : index
    %80 = vector.load %arg7[%c0_48, %c128_49] : memref<32x512xf32, #tpu.memory_space<vmem>>, vector<32x256xf32>
    tpu.vector_store %arg7[%c0_48, %c128_49], %79 {strides = array<i32>} : memref<32x512xf32, #tpu.memory_space<vmem>>, vector<32x256xf32>,
    %c0_50 = arith.constant 0 : index
    %c111_51 = arith.constant 111 : index
    %81 = vector.load %arg7[%c0_50, %c111_51] : memref<32x512xf32, #tpu.memory_space<vmem>>, vector<32x256xf32>
    %cst_52 = arith.constant 0.000000e+00 : f32
    %82 = vector.broadcast %cst_52 : f32 to vector<32x256xf32>
    %83 = vector.shape_cast %20 : vector<1x256xi1> to vector<1x256xi1>
    %84 = vector.broadcast %83 : vector<1x256xi1> to vector<32x256xi1>
    %85 = arith.select %84, %81, %82 : vector<32x256xi1>, vector<32x256xf32>
    %c0_53 = arith.constant 0 : index
    %c0_54 = arith.constant 0 : index
    %86 = vector.load %arg8[%c0_53, %c0_54] : memref<288x256xf32, #tpu.memory_space<vmem>>, vector<32x256xf32>
    tpu.vector_store %arg8[%c0_53, %c0_54], %85 {strides = array<i32>} : memref<288x256xf32, #tpu.memory_space<vmem>>, vector<32x256xf32>,
    %c0_55 = arith.constant 0 : index
    %c112_56 = arith.constant 112 : index
    %87 = vector.load %arg7[%c0_55, %c112_56] : memref<32x512xf32, #tpu.memory_space<vmem>>, vector<32x256xf32>
    %c32_57 = arith.constant 32 : index
    %c0_58 = arith.constant 0 : index
    %88 = vector.load %arg8[%c32_57, %c0_58] : memref<288x256xf32, #tpu.memory_space<vmem>>, vector<32x256xf32>
    tpu.vector_store %arg8[%c32_57, %c0_58], %87 {strides = array<i32>} : memref<288x256xf32, #tpu.memory_space<vmem>>, vector<32x256xf32>,
    %c0_59 = arith.constant 0 : index
    %c113_60 = arith.constant 113 : index
    %89 = vector.load %arg7[%c0_59, %c113_60] : memref<32x512xf32, #tpu.memory_space<vmem>>, vector<32x256xf32>
    %cst_61 = arith.constant 0.000000e+00 : f32
    %90 = vector.broadcast %cst_61 : f32 to vector<32x256xf32>
    %91 = vector.shape_cast %22 : vector<1x256xi1> to vector<1x256xi1>
    %92 = vector.broadcast %91 : vector<1x256xi1> to vector<32x256xi1>
    %93 = arith.select %92, %89, %90 : vector<32x256xi1>, vector<32x256xf32>
    %c64_62 = arith.constant 64 : index
    %c0_63 = arith.constant 0 : index
    %94 = vector.load %arg8[%c64_62, %c0_63] : memref<288x256xf32, #tpu.memory_space<vmem>>, vector<32x256xf32>
    tpu.vector_store %arg8[%c64_62, %c0_63], %93 {strides = array<i32>} : memref<288x256xf32, #tpu.memory_space<vmem>>, vector<32x256xf32>,
    %c0_64 = arith.constant 0 : index
    %c127_65 = arith.constant 127 : index
    %95 = vector.load %arg7[%c0_64, %c127_65] : memref<32x512xf32, #tpu.memory_space<vmem>>, vector<32x256xf32>
    %cst_66 = arith.constant 0.000000e+00 : f32
    %96 = vector.broadcast %cst_66 : f32 to vector<32x256xf32>
    %97 = vector.shape_cast %20 : vector<1x256xi1> to vector<1x256xi1>
    %98 = vector.broadcast %97 : vector<1x256xi1> to vector<32x256xi1>
    %99 = arith.select %98, %95, %96 : vector<32x256xi1>, vector<32x256xf32>
    %c96_67 = arith.constant 96 : index
    %c0_68 = arith.constant 0 : index
    %100 = vector.load %arg8[%c96_67, %c0_68] : memref<288x256xf32, #tpu.memory_space<vmem>>, vector<32x256xf32>
    tpu.vector_store %arg8[%c96_67, %c0_68], %99 {strides = array<i32>} : memref<288x256xf32, #tpu.memory_space<vmem>>, vector<32x256xf32>,
    %c0_69 = arith.constant 0 : index
    %c128_70 = arith.constant 128 : index
    %101 = vector.load %arg7[%c0_69, %c128_70] : memref<32x512xf32, #tpu.memory_space<vmem>>, vector<32x256xf32>
    %c128_71 = arith.constant 128 : index
    %c0_72 = arith.constant 0 : index
    %102 = vector.load %arg8[%c128_71, %c0_72] : memref<288x256xf32, #tpu.memory_space<vmem>>, vector<32x256xf32>
    tpu.vector_store %arg8[%c128_71, %c0_72], %101 {strides = array<i32>} : memref<288x256xf32, #tpu.memory_space<vmem>>, vector<32x256xf32>,
    %c0_73 = arith.constant 0 : index
    %c129_74 = arith.constant 129 : index
    %103 = vector.load %arg7[%c0_73, %c129_74] : memref<32x512xf32, #tpu.memory_space<vmem>>, vector<32x256xf32>
    %cst_75 = arith.constant 0.000000e+00 : f32
    %104 = vector.broadcast %cst_75 : f32 to vector<32x256xf32>
    %105 = vector.shape_cast %22 : vector<1x256xi1> to vector<1x256xi1>
    %106 = vector.broadcast %105 : vector<1x256xi1> to vector<32x256xi1>
    %107 = arith.select %106, %103, %104 : vector<32x256xi1>, vector<32x256xf32>
    %c160_76 = arith.constant 160 : index
    %c0_77 = arith.constant 0 : index
    %108 = vector.load %arg8[%c160_76, %c0_77] : memref<288x256xf32, #tpu.memory_space<vmem>>, vector<32x256xf32>
    tpu.vector_store %arg8[%c160_76, %c0_77], %107 {strides = array<i32>} : memref<288x256xf32, #tpu.memory_space<vmem>>, vector<32x256xf32>,
    %c0_78 = arith.constant 0 : index
    %c143_79 = arith.constant 143 : index
    %109 = vector.load %arg7[%c0_78, %c143_79] : memref<32x512xf32, #tpu.memory_space<vmem>>, vector<32x256xf32>
    %cst_80 = arith.constant 0.000000e+00 : f32
    %110 = vector.broadcast %cst_80 : f32 to vector<32x256xf32>
    %111 = vector.shape_cast %20 : vector<1x256xi1> to vector<1x256xi1>
    %112 = vector.broadcast %111 : vector<1x256xi1> to vector<32x256xi1>
    %113 = arith.select %112, %109, %110 : vector<32x256xi1>, vector<32x256xf32>
    %c192_81 = arith.constant 192 : index
    %c0_82 = arith.constant 0 : index
    %114 = vector.load %arg8[%c192_81, %c0_82] : memref<288x256xf32, #tpu.memory_space<vmem>>, vector<32x256xf32>
    tpu.vector_store %arg8[%c192_81, %c0_82], %113 {strides = array<i32>} : memref<288x256xf32, #tpu.memory_space<vmem>>, vector<32x256xf32>,
    %c0_83 = arith.constant 0 : index
    %c144_84 = arith.constant 144 : index
    %115 = vector.load %arg7[%c0_83, %c144_84] : memref<32x512xf32, #tpu.memory_space<vmem>>, vector<32x256xf32>
    %c224_85 = arith.constant 224 : index
    %c0_86 = arith.constant 0 : index
    %116 = vector.load %arg8[%c224_85, %c0_86] : memref<288x256xf32, #tpu.memory_space<vmem>>, vector<32x256xf32>
    tpu.vector_store %arg8[%c224_85, %c0_86], %115 {strides = array<i32>} : memref<288x256xf32, #tpu.memory_space<vmem>>, vector<32x256xf32>,
    %c0_87 = arith.constant 0 : index
    %c145_88 = arith.constant 145 : index
    %117 = vector.load %arg7[%c0_87, %c145_88] : memref<32x512xf32, #tpu.memory_space<vmem>>, vector<32x256xf32>
    %cst_89 = arith.constant 0.000000e+00 : f32
    %118 = vector.broadcast %cst_89 : f32 to vector<32x256xf32>
    %119 = vector.shape_cast %22 : vector<1x256xi1> to vector<1x256xi1>
    %120 = vector.broadcast %119 : vector<1x256xi1> to vector<32x256xi1>
    %121 = arith.select %120, %117, %118 : vector<32x256xi1>, vector<32x256xf32>
    %c256_90 = arith.constant 256 : index
    %c0_91 = arith.constant 0 : index
    %122 = vector.load %arg8[%c256_90, %c0_91] : memref<288x256xf32, #tpu.memory_space<vmem>>, vector<32x256xf32>
    tpu.vector_store %arg8[%c256_90, %c0_91], %121 {strides = array<i32>} : memref<288x256xf32, #tpu.memory_space<vmem>>, vector<32x256xf32>,
    %c0_92 = arith.constant 0 : index
    %c0_93 = arith.constant 0 : index
    %123 = vector.load %arg8[%c0_92, %c0_93] : memref<288x256xf32, #tpu.memory_space<vmem>>, vector<288x256xf32>
    %cst_94 = arith.constant dense<0.000000e+00> : vector<32x256xf32>
    %124 = tpu.matmul %24, %123, %cst_94 {dimension_numbers = #tpu.dot_dimension_numbers<[1], [0], [0], [1], [0, 0, 1, 1], [], []>} : vector<32x288xf32>, vector<288x256xf32>, vector<32x256xf32> -> vector<32x256xf32>
    %125 = vector.broadcast %26 : vector<32x1xf32> to vector<32x256xf32>
    %126 = arith.addf %124, %125 : vector<32x256xf32>
    %cst_95 = arith.constant 2.000000e-01 : f32
    %127 = vector.broadcast %cst_95 : f32 to vector<32x256xf32>
    %128 = arith.mulf %126, %127 : vector<32x256xf32>
    %129 = arith.addf %128, %29 : vector<32x256xf32>
    %130 = arith.index_cast %c0_i32_13 : i32 to index
    %c0_96 = arith.constant 0 : index
    %c0_97 = arith.constant 0 : index
    %131 = vector.load %arg6[%130, %c0_96, %c0_97] : memref<1x32x256xf32, #tpu.memory_space<vmem>>, vector<1x32x256xf32>
    %132 = vector.shape_cast %131 : vector<1x32x256xf32> to vector<32x256xf32>
    %133 = vector.shape_cast %129 : vector<32x256xf32> to vector<1x32x256xf32>
    tpu.vector_store %arg6[%130, %c0_96, %c0_97], %133 {strides = array<i32>} : memref<1x32x256xf32, #tpu.memory_space<vmem>>, vector<1x32x256xf32>,
    %c1_i32_98 = arith.constant 1 : i32
    return
  }
  func.func @transform_0(%arg0: i32) -> (i32, i32, i32) {
    %c0_i32 = arith.constant 0 : i32
    %c0_i32_0 = arith.constant 0 : i32
    %c0_i32_1 = arith.constant 0 : i32
    return %arg0, %c0_i32, %c0_i32_0 : i32, i32, i32
  }
  func.func @transform_1(%arg0: i32) -> (i32, i32) {
    %c0_i32 = arith.constant 0 : i32
    %c0_i32_0 = arith.constant 0 : i32
    %c0_i32_1 = arith.constant 0 : i32
    return %c0_i32, %c0_i32_0 : i32, i32
  }
  func.func @transform_2(%arg0: i32) -> (i32, i32) {
    %c0_i32 = arith.constant 0 : i32
    %c0_i32_0 = arith.constant 0 : i32
    %c0_i32_1 = arith.constant 0 : i32
    return %c0_i32, %c0_i32_0 : i32, i32
  }
  func.func @transform_3(%arg0: i32) -> (i32, i32) {
    %c0_i32 = arith.constant 0 : i32
    %c0_i32_0 = arith.constant 0 : i32
    %c0_i32_1 = arith.constant 0 : i32
    return %c0_i32, %c0_i32_0 : i32, i32
  }
  func.func @transform_4(%arg0: i32) -> (i32, i32) {
    %c0_i32 = arith.constant 0 : i32
    %c0_i32_0 = arith.constant 0 : i32
    %c0_i32_1 = arith.constant 0 : i32
    return %c0_i32, %c0_i32_0 : i32, i32
  }
  func.func @transform_5(%arg0: i32) -> (i32, i32, i32) {
    %c0_i32 = arith.constant 0 : i32
    %c0_i32_0 = arith.constant 0 : i32
    %c0_i32_1 = arith.constant 0 : i32
    return %arg0, %c0_i32, %c0_i32_0 : i32, i32, i32
  }
}

</mosaic_0001>

<bundles_post_ra>
// kernel: tpu_custom_call.1
= control target key start
LH: loop header
LB: loop body
LE: loop exit
PB: predicated region body
PF: predicated region fallthrough
CT: control target
= control target key end

     0   :  { %10 = vsyncpa [#allocation5], 0  ;;  %s4094_s0 = inlined_call_operand.hbm [shape: f32[2,32,256], index: 0, kind: input, shape index: {}]   ;;  %s4095_s1 = inlined_call_operand.hbm [shape: f32[32,288], index: 1, kind: input, shape index: {}]   ;;  %s4096_s2 = inlined_call_operand.vmem [shape: f32[32,1], index: 2, kind: input, shape index: {}]   ;;  %s4097_s3 = inlined_call_operand.hbm [shape: f32[32,288], index: 3, kind: input, shape index: {}]   ;;  %s4098_s4 = inlined_call_operand.vmem [shape: f32[32,1], index: 4, kind: input, shape index: {}]   ;;  %s4099_s5 = inlined_call_operand.hbm [shape: f32[2,32,256], index: 5, kind: output, shape index: {}]  }
   0x1   :  { %12 = vsyncpa [#allocation5 + $0x1], 0 }
   0x2   :  { %13 = vsyncpa [#allocation8], 0 }
   0x3   :  { %14 = vsyncpa [#allocation6], 0 }
   0x4   :  { %16 = vsyncpa [#allocation6 + $0x1], 0  ;;  %s2965_s18 = smov 0   ;;  %s2967_s19 = smov 0  }
   0x5   :  { %s2969_s20 = smov 0   ;;  %s2971_s21 = smov 0  }
   0x6 LB: > { %s2986_s22 = sadd.s32 4294967295, %s2914_s21   ;;  %s2382_s23 = sadd.s32 4294967294, %s2914_s21   ;;  %s2914_s21 = sphi %s2971_s21, %s4134_s21   ;;  %s2910_s20 = sphi %s2969_s20, %s4133_s20   ;;  %s2906_s19 = sphi %s2967_s19, %s4132_s19   ;;  %s2902_s18 = sphi %s2965_s18, %s4131_s18  }
   0x7   : > { %p42_p0 = scmp.ne.s32.totalorder %s2906_s19, %s2902_s18  ;;  %p4100_p1 = scmp.eq.s32.totalorder %s2986_s22, 0 }
   0x8   : > { %p156_p3 = scmp.eq.s32.totalorder %s2382_s23, 1  ;;  %p2383_p5 = scmp.ge.s32.totalorder %s2914_s21, 1 }
   0x9   : > { %p2995_p4 = por %p4100_p1, %p42_p0  ;;  %p163_p7 = scmp.lt.s32.totalorder %s2914_s21, 3 }
   0xa   : > { %p3000_p6 = por %p156_p3, %p42_p0  ;;  %s2916_s27 = smov [#allocation7]  }
   0xb   : > { %s4107_s24 = scalar_select %p2995_p4, 1, 0 }
   0xc   : > { %s4108_s25 = scalar_select %p3000_p6, 1, 0 }
   0xd   : > { %p3005_p8 = pnand %p2383_p5, %p163_p7  ;;  %s175_s28 = sshll.u32 %s2916_s27, 4  ;;  %s176_s28 = int_to_ptr.vmem [resolvable:$true] %s175_s28 }
   0xe   : > { %s2917_s30 = smov [#allocation9]   ;;  %s2777_s7 = scalar_lea.vmem %s176_s28, 1536 }
   0xf   : > { %s4109_s26 = scalar_select %p3005_p8, 1, 0 }
  0x10   : > { %p2526_p9 = pneg %p3005_p8  ;;  %s191_s6 = sshll.u32 %s2917_s30, 4  ;;  %s192_s6 = int_to_ptr.vmem [resolvable:$true] %s191_s6 }
  0x11   : > { %p2778_p13 = scmp.ne.s32.totalorder %s176_s28, %s2777_s7  ;;  %p2785_p5 = scmp.lt.s32.totalorder %s176_s28, %s176_s28 }
  0x12   : > { %p3014_p11 = pnand %p2526_p9, %p4100_p1  ;;  %p2786_p7 = scmp.lt.s32.totalorder %s2777_s7, %s2777_s7 }
  0x14   : > { %p2768_p12 = pneg %p3014_p11  ;;  %p2787_p10 = por %p2786_p7, %p2785_p5 }
  0x16   : > { %p2780_p0 = pnand %p2778_p13, %p2768_p12 }
  0x18   : > { %p2781_p3 = pneg %p2780_p0 }
  0x1a   : > { %p2788_p9 = pnand %p2787_p10, %p2781_p3 }
  0x1c   : > { %2791 = shalt.err (!%p2788_p9)
}
  0x1d   : > { %s2918_s8 = smov 384   ;;  %s2919_s9 = smov 24  }
  0x1e   : > { %2529 = dma.hbm_to_vmem [thread:$0]  (!%p3014_p11), %s4095_s1, 1536, %s176_s28, [#allocation8], %s2918_s8, %s2918_s8, %s2919_s9  }
  0x1f   : > { %s2803_s12 = scalar_lea.vmem %s192_s6, 1536  ;;  %p2811_p2 = scmp.lt.s32.totalorder %s192_s6, %s192_s6 }
  0x20   : > { %p2804_p1 = scmp.ne.s32.totalorder %s192_s6, %s2803_s12  ;;  %p2812_p6 = scmp.lt.s32.totalorder %s2803_s12, %s2803_s12 }
  0x22   : > { %p2806_p13 = pnand %p2804_p1, %p2768_p12  ;;  %p2813_p5 = por %p2812_p6, %p2811_p2 }
  0x24   : > { %p2807_p0 = pneg %p2806_p13 }
  0x26   : > { %p2814_p10 = pnand %p2813_p5, %p2807_p0 }
  0x28   : > { %2817 = shalt.err (!%p2814_p10)
}
  0x29   : > { %2532 = dma.hbm_to_vmem [thread:$0]  (!%p3014_p11), %s4097_s3, 1536, %s192_s6, [#allocation8], %s2918_s8, %s2918_s8, %s2919_s9  }
  0x2a   : > { %s3037_s15 = sadd.s32 1, %s2914_s21   ;;  %s29_s16 = sadd.s32 1, %s2910_s20 }
  0x2b   : > { %s26_s17 = ssub.s32 %s2914_s21, %s3037_s15  ;;  %p36_p1 = scmp.ne.s32.totalorder %s2910_s20, %s2906_s19 }
  0x2c   : > { %p27_p2 = scmp.eq.s32.totalorder %s26_s17, 0  ;;  %p37_p6 = scmp.eq.s32.totalorder %s2914_s21, 0 }
  0x2d   : > { %p4111_p12 = scmp.eq.s32.totalorder %s2986_s22, 1  ;;  %p2543_p7 = scmp.lt.s32.totalorder %s2914_s21, 2 }
  0x2e   : > { %s3053_s27 = scalar_select %p27_p2, %s2910_s20, %s29_s16  }
  0x2f   : > { %p3047_p3 = por %p4111_p12, %p36_p1  ;;  %p38_p9 = por %p37_p6, %p36_p1 }
  0x30   : > { %s208_s28 = sand.u32 1, %s2910_s20   ;;  %s2408_s30 = sshll.u32 %s2914_s21, 10 }
  0x31   : > { %s4112_s23 = scalar_select %p3047_p3, 1, 0 }
  0x32   : > { %s2387_s29 = sshll.u32 %s208_s28, 6  ;;  %s3060_s8 = scalar_lea.hbm %s4094_s0, %s2408_s30 }
  0x33   : > { %s212_s9 = scalar_lea.vmem [#allocation4], %s2387_s29  ;;  %p3064_p11 = pnand %p2543_p7, %p38_p9 }
  0x34   : > { %s219_s10 = sshll.u32 %s212_s9, 4  ;;  %s3068_s12 = scalar_lea.sflag [#allocation5], %s208_s28  ;;  %s3062_s10 = int_to_ptr.vmem [resolvable:$true] %s219_s10 }
  0x35   : > { %s2818_s13 = scalar_lea.hbm %s3060_s8, 1024  ;;  %p2820_p0 = pneg %p3064_p11 }
  0x36   : > { %p2819_p13 = scmp.ne.s32.totalorder %s3060_s8, %s2818_s13  ;;  %s2823_s17 = scalar_lea.hbm %s4094_s0, 2048 }
  0x37   : > { %p2824_p1 = scmp.lt.s32.totalorder %s3060_s8, %s4094_s0  ;;  %p2825_p2 = scmp.lt.s32.totalorder %s2823_s17, %s2818_s13 }
  0x38   : > { %p2821_p5 = pnand %p2820_p0, %p2819_p13 }
  0x39   : > { %p2826_p6 = por %p2825_p2, %p2824_p1 }
  0x3a   : > { %p2822_p10 = pneg %p2821_p5 }
  0x3c   : > { %p2827_p12 = pnand %p2826_p6, %p2822_p10 }
  0x3e   : > { %2830 = shalt.err (!%p2827_p12)
}
  0x3f   : > { %s2831_s28 = scalar_lea.vmem %s3062_s10, 1024  ;;  %s2920_s6 = smov [#allocation4]  }
  0x40   : > { %p2832_p7 = scmp.ne.s32.totalorder %s3062_s10, %s2831_s28  ;;  %s2836_s7 = sshll.u32 %s2920_s6, 4  ;;  %s2837_s7 = int_to_ptr.vmem [resolvable:$false] %s2836_s7 }
  0x41   : > { %s2838_s9 = scalar_lea.vmem %s2837_s7, 2048  ;;  %p2839_p5 = scmp.lt.s32.totalorder %s3062_s10, %s2837_s7 }
  0x42   : > { %p2834_p9 = pnand %p2832_p7, %p2820_p0  ;;  %p2840_p3 = scmp.lt.s32.totalorder %s2838_s9, %s2831_s28 }
  0x44   : > { %p2835_p13 = pneg %p2834_p9  ;;  %p2841_p4 = por %p2840_p3, %p2839_p5 }
  0x46   : > { %p2842_p8 = pnand %p2841_p4, %p2835_p13 }
  0x48   : > { %2845 = shalt.err (!%p2842_p8)
}
  0x49   : > { %s2921_s13 = smov 256   ;;  %s2922_s14 = smov 16  }
  0x4a   : > { %2536 = dma.hbm_to_vmem [thread:$0]  (!%p3064_p11), %s3060_s8, 1024, %s3062_s10, %s3068_s12, %s2921_s13, %s2921_s13, %s2922_s14  }
  0x4b   : > { %p4114_p0 = scmp.ne.s32.totalorder %s4109_s26, 0 }
  0x4c   : > { %s3092_s16 = sand.u32 (!%p4114_p0), 1, %s2906_s19   ;;  %p4115_p4 = scmp.ne.s32.totalorder (!%p4114_p0), %s4107_s24, 0 }
  0x4d   : > { %231 = sbr.rel (%p4114_p0) target bundleno = 1039 (0x40f), region = 40  ;;  %s4104_s17 = sshll.u32 (!%p4114_p0), %s3092_s16, 6 }
  0x4e   : > { %s234_s29 = scalar_lea.sflag (!%p4114_p0), [#allocation5], %s3092_s16  ;;  %s3098_s30 = scalar_lea.vmem (!%p4114_p0), [#allocation4], %s4104_s17 }
  0x52   : > { %2889 = dma.done.wait (%p4115_p4), %s234_s29, 1024  }
  0x53   : > { %2891 = vsyncadd (%p4115_p4), %s234_s29, 4294966272  ;;  %p4116_p8 = scmp.eq.s32.totalorder %s2986_s22, 0 }
  0x55   : > { %2893 = dma.done.wait (%p4116_p8), [#allocation8], 3072   ;;  %p4117_p3 = pmov %p4116_p8 }
  0x56   : > { %v4105_v0 = vmov 0.0   ;;  %s2924_s26 = smov 1   ;;  %v3112_v1 = vld [vmem:[%s3098_s30 + $0x30] sm:$0xff]  ;;  %v3115_v2 = vld [vmem:[%s3098_s30 + $0x20] sm:$0xff]  ;;  %v3122_v3 = vld [vmem:[%s3098_s30 + $0x38] sm:$0xff]  ;;  %s2925_s24 = smov 15   ;;  %v288_v9 = vlaneseq }
  0x57   : > { %2895 = vsyncadd (%p4117_p3), [#allocation8], 4294964224  ;;  %1281 = vmatprep.mubr.f32.mxu1 %v4105_v0  ;;  %2597 = vrot.lane.b32.xlu1 %v4105_v0, %s2924_s26  ;;  %v3125_v4 = vld [vmem:[%s3098_s30 + $0x10] sm:$0xff]  ;;  %v3132_v5 = vld [vmem:[%s3098_s30 + $0x28] sm:$0xff]  ;;  %s2926_s8 = smov 16   ;;  %s2927_s10 = smov 17  }
  0x58   : > { %654 = vrot.lane.b32.xlu0 %v3112_v1, %s2924_s26  ;;  %v3139_v6 = vld [vmem:[%s3098_s30 + $0x18] sm:$0xff]  ;;  %v3142_v7 = vld [vmem:[%s3098_s30 + $0x8] sm:$0xff]  ;;  %v3149_v8 = vld [vmem:[%s3098_s30] sm:$0xff]  ;;  %s2928_s11 = smov 112   ;;  %s2929_s12 = smov 113   ;;  %v3243_v10 = vand.u32 127, %v288_v9 }
  0x59   : > { %s2930_s28 = smov 127   ;;  %vm658_vm1 = vcmask 7168   ;;  %vm577_vm3 = vcmask 121856   ;;  %v320_v39 = vld [vmem:[#allocation7 + $0x8] sm:$0xff]  ;;  %s2931_s6 = smov 111   ;;  %vm500_vm6 = vcmask 130048  }
  0x5a   : > { %v290_v12 = vadd.s32 128, %v3243_v10  ;;  %v295_v16 = vand.u32 15, %v3243_v10  ;;  %1192 = vmatprep.mubr.f32.mxu0 %v320_v39  ;;  %vm419_vm7 = vcmask 138240   ;;  %vm917_vm8 = vcmask 916480   ;;  %v339_v40 = vld [vmem:[#allocation9 + $0x40] sm:$0xff]  ;;  %s2409_s7 = sshll.u32 %s2986_s22, 10 }
  0x5b   : > { %648 = vrot.lane.b32.xlu1 %v3115_v2, %s2924_s26  ;;  %vm836_vm9 = vcmask 924672   ;;  %vm755_vm10 = vcmask 1039360   ;;  %vm990_vm11 = vcmask 908288   ;;  %vm1115_vm12 = vcmask 261120   ;;  %s4048_s22 = scalar_lea.hbm %s4099_s5, %s2409_s7  ;;  %p4128_p10 = scmp.ne.s32.totalorder %s4112_s23, 0 }
  0x5c   : > { %656 = vrot.lane.b32.xlu0 %v3122_v3, %s2924_s26  ;;  %v302_v13 = vand.u32 15, %v290_v12  ;;  %vm3263_vm2 = vcmp.gt.s32.totalorder %v295_v16, 0  ;;  %vm3318_vm5 = vcmp.lt.s32.totalorder %v295_v16, 15 }
  0x5e   : > { %vm3259_vm0 = vcmp.gt.s32.totalorder %v302_v13, 0  ;;  %vm3303_vm4 = vcmp.lt.s32.totalorder %v302_v13, 15 }
  0x5f   : > { %642 = vrot.lane.b32.xlu1 %v3125_v4, %s2924_s26 }
  0x60   : > { %650 = vrot.lane.b32.xlu0 %v3132_v5, %s2924_s26 }
  0x63   : > { %2602 = vrot.lane.b32.xlu1 %v4105_v0, %s2924_s26 }
  0x64   : > { %644 = vrot.lane.b32.xlu0 %v3139_v6, %s2924_s26 }
  0x67   : > { %638 = vrot.lane.b32.xlu1 %v3142_v7, %s2924_s26 }
  0x68   : > { %636 = vrot.lane.b32.xlu0 %v3149_v8, %s2924_s26 }
  0x6b   : > { %575 = vrot.lane.b32.xlu1 %v3122_v3, %s2925_s24 }
  0x6c   : > { %573 = vrot.lane.b32.xlu0 %v3112_v1, %s2925_s24 }
  0x6f   : > { %567 = vrot.lane.b32.xlu1 %v3115_v2, %s2925_s24 }
  0x70   : > { %2607 = vrot.lane.b32.xlu0 %v4105_v0, %s2925_s24 }
  0x73   : > { %561 = vrot.lane.b32.xlu1 %v3125_v4, %s2925_s24 }
  0x74   : > { %569 = vrot.lane.b32.xlu0 %v3132_v5, %s2925_s24 }
  0x77   : > { %2612 = vrot.lane.b32.xlu1 %v4105_v0, %s2925_s24 }
  0x78   : > { %563 = vrot.lane.b32.xlu0 %v3139_v6, %s2925_s24 }
  0x7b   : > { %557 = vrot.lane.b32.xlu1 %v3142_v7, %s2925_s24 }
  0x7c   : > { %555 = vrot.lane.b32.xlu0 %v3149_v8, %s2925_s24 }
  0x7f   : > { %498 = vrot.lane.b32.xlu1 %v3122_v3, %s2926_s8 }
  0x80   : > { %496 = vrot.lane.b32.xlu0 %v3112_v1, %s2926_s8 }
  0x83   : > { %490 = vrot.lane.b32.xlu1 %v3115_v2, %s2926_s8 }
  0x84   : > { %2617 = vrot.lane.b32.xlu0 %v4105_v0, %s2926_s8 }
  0x87   : > { %484 = vrot.lane.b32.xlu1 %v3125_v4, %s2926_s8 }
  0x88   : > { %492 = vrot.lane.b32.xlu0 %v3132_v5, %s2926_s8 }
  0x8b   : > { %2622 = vrot.lane.b32.xlu1 %v4105_v0, %s2926_s8 }
  0x8c   : > { %486 = vrot.lane.b32.xlu0 %v3139_v6, %s2926_s8 }
  0x8f   : > { %480 = vrot.lane.b32.xlu1 %v3142_v7, %s2926_s8 }
  0x90   : > { %478 = vrot.lane.b32.xlu0 %v3149_v8, %s2926_s8 }
  0x93   : > { %417 = vrot.lane.b32.xlu1 %v3122_v3, %s2927_s10 }
  0x94   : > { %415 = vrot.lane.b32.xlu0 %v3112_v1, %s2927_s10 }
  0x97   : > { %409 = vrot.lane.b32.xlu1 %v3115_v2, %s2927_s10 }
  0x98   : > { %2627 = vrot.lane.b32.xlu0 %v4105_v0, %s2927_s10 }
  0x9b   : > { %403 = vrot.lane.b32.xlu1 %v3125_v4, %s2927_s10 }
  0x9c   : > { %411 = vrot.lane.b32.xlu0 %v3132_v5, %s2927_s10 }
  0x9f   : > { %2632 = vrot.lane.b32.xlu1 %v4105_v0, %s2927_s10 }
  0xa0   : > { %405 = vrot.lane.b32.xlu0 %v3139_v6, %s2927_s10 }
  0xa3   : > { %399 = vrot.lane.b32.xlu1 %v3142_v7, %s2927_s10 }
  0xa4   : > { %397 = vrot.lane.b32.xlu0 %v3149_v8, %s2927_s10 }
  0xa7   : > { %2637 = vrot.lane.b32.xlu1 %v4105_v0, %s2928_s11 }
  0xa8   : > { %913 = vrot.lane.b32.xlu0 %v3122_v3, %s2928_s11 }
  0xab   : > { %907 = vrot.lane.b32.xlu1 %v3132_v5, %s2928_s11 }
  0xac   : > { %911 = vrot.lane.b32.xlu0 %v3112_v1, %s2928_s11 }
  0xaf   : > { %901 = vrot.lane.b32.xlu1 %v3139_v6, %s2928_s11 }
  0xb0   : > { %905 = vrot.lane.b32.xlu0 %v3115_v2, %s2928_s11 }
  0xb3   : > { %899 = vrot.lane.b32.xlu1 %v3125_v4, %s2928_s11 }
  0xb4   : > { %2642 = vrot.lane.b32.xlu0 %v4105_v0, %s2928_s11 }
  0xb7   : > { %893 = vrot.lane.b32.xlu1 %v3149_v8, %s2928_s11 }
  0xb8   : > { %895 = vrot.lane.b32.xlu0 %v3142_v7, %s2928_s11 }
  0xbb   : > { %2647 = vrot.lane.b32.xlu1 %v4105_v0, %s2929_s12 }
  0xbc   : > { %832 = vrot.lane.b32.xlu0 %v3122_v3, %s2929_s12 }
  0xbf   : > { %826 = vrot.lane.b32.xlu1 %v3132_v5, %s2929_s12 }
  0xc0   : > { %830 = vrot.lane.b32.xlu0 %v3112_v1, %s2929_s12 }
  0xc3   : > { %820 = vrot.lane.b32.xlu1 %v3139_v6, %s2929_s12 }
  0xc4   : > { %824 = vrot.lane.b32.xlu0 %v3115_v2, %s2929_s12 }
  0xc7   : > { %818 = vrot.lane.b32.xlu1 %v3125_v4, %s2929_s12 }
  0xc8   : > { %2652 = vrot.lane.b32.xlu0 %v4105_v0, %s2929_s12 }
  0xc9   : > { %v2598_v11 = vpop.permute.xlu1 %2597 }
  0xca   : > { %v655_v14 = vpop.permute.xlu0 %654  ;;  %v2599_v17 = vunpack.i.l.bf16 %v2598_v11  ;;  %v2600_v23 = vunpack.i.h.bf16 %v2598_v11 }
  0xcb   : > { %812 = vrot.lane.b32.xlu1 %v3149_v8, %s2929_s12 }
  0xcc   : > { %814 = vrot.lane.b32.xlu0 %v3142_v7, %s2929_s12  ;;  %v665_v24 = vsel %vm658_vm1, %v2599_v17, %v655_v14  ;;  %v2932_v17 = vmov 0  }
  0xcd   : > { %v649_v15 = vpop.permute.xlu1 %648  ;;  %2676 = vset.pattern.permute.xlu0 %v2932_v17  ;;  %2677 = vset.pattern.permute.xlu1 %v2932_v17 }
  0xce   : > { %v657_v19 = vpop.permute.xlu0 %656  ;;  %v663_v29 = vsel %vm658_vm1, %v2600_v23, %v649_v15 }
  0xcf   : > { %2657 = vrot.lane.b32.xlu1 %v4105_v0, %s2930_s28  ;;  %v666_v22 = vsel %vm658_vm1, %v655_v14, %v657_v19  ;;  %v346_v14 = vld [vmem:[%s4096_s2 + $0x18] sm:$0xff] }
  0xd0   : > { %2410 = vmatprep.subr.msk.mxu0 %vm3259_vm0, %v666_v22  ;;  %751 = vrot.lane.b32.xlu0 %v3122_v3, %s2930_s28  ;;  %v343_v22 = vld [vmem:[%s4096_s2] sm:$0xff] }
  0xd1   : > { %v643_v20 = vpop.permute.xlu1 %642  ;;  %2411 = vmatpush1.msk.msra.mxu0 %vm3263_vm2, %v665_v24 }
  0xd2   : > { %v651_v25 = vpop.permute.xlu0 %650 }
  0xd3   : > { %745 = vrot.lane.b32.xlu1 %v3132_v5, %s2930_s28  ;;  %v664_v27 = vsel %vm658_vm1, %v649_v15, %v651_v25  ;;  %v345_v15 = vld [vmem:[%s4096_s2 + $0x10] sm:$0xff]  ;;  %v344_v25 = vld [vmem:[%s4096_s2 + $0x8] sm:$0xff] }
  0xd4   : > { %2412 = vmatprep.subr.msk.mxu0 %vm3259_vm0, %v664_v27  ;;  %749 = vrot.lane.b32.xlu0 %v3112_v1, %s2930_s28 }
  0xd5   : > { %v2603_v26 = vpop.permute.xlu1 %2602  ;;  %2413 = vmatpush1.msk.msra.mxu0 %vm3263_vm2, %v663_v29 }
  0xd6   : > { %v2604_v28 = vunpack.i.l.bf16 %v2603_v26  ;;  %v645_v30 = vpop.permute.xlu0 %644  ;;  %v2605_v32 = vunpack.i.h.bf16 %v2603_v26 }
  0xd7   : > { %739 = vrot.lane.b32.xlu1 %v3139_v6, %s2930_s28  ;;  %v662_v33 = vsel %vm658_vm1, %v643_v20, %v645_v30 }
  0xd8   : > { %2414 = vmatprep.subr.msk.mxu0 %vm3259_vm0, %v662_v33  ;;  %743 = vrot.lane.b32.xlu0 %v3115_v2, %s2930_s28  ;;  %v661_v34 = vsel %vm658_vm1, %v2604_v28, %v643_v20 }
  0xd9   : > { %v639_v31 = vpop.permute.xlu1 %638  ;;  %2415 = vmatpush1.msk.msra.mxu0 %vm3263_vm2, %v661_v34 }
  0xda   : > { %v637_v36 = vpop.permute.xlu0 %636 }
  0xdb   : > { %737 = vrot.lane.b32.xlu1 %v3125_v4, %s2930_s28  ;;  %v660_v37 = vsel %vm658_vm1, %v637_v36, %v639_v31  ;;  %v659_v38 = vsel %vm658_vm1, %v2605_v32, %v637_v36 }
  0xdc   : > { %2662 = vrot.lane.b32.xlu0 %v4105_v0, %s2930_s28  ;;  %2416 = vmatprep.subr.msk.mxu0 %vm3259_vm0, %v660_v37 }
  0xdd   : > { %v576_v35 = vpop.permute.xlu1 %575  ;;  %2417 = vmatpush1.msk.msra.mxu0 %vm3263_vm2, %v659_v38 }
  0xde   : > { %v574_v42 = vpop.permute.xlu0 %573 }
  0xdf   : > { %731 = vrot.lane.b32.xlu1 %v3149_v8, %s2930_s28  ;;  %v585_v43 = vsel %vm577_vm3, %v574_v42, %v576_v35 }
  0xe0   : > { %733 = vrot.lane.b32.xlu0 %v3142_v7, %s2930_s28  ;;  %2418 = vmatprep.subr.msk.mxu0 %vm3303_vm4, %v585_v43 }
  0xe1   : > { %v568_v41 = vpop.permute.xlu1 %567 }
  0xe2   : > { %v2608_v45 = vpop.permute.xlu0 %2607 }
  0xe3   : > { %2667 = vrot.lane.b32.xlu1 %v4105_v0, %s2931_s6  ;;  %v2609_v47 = vunpack.i.l.bf16 %v2608_v45  ;;  %v2610_v48 = vunpack.i.h.bf16 %v2608_v45 }
  0xe4   : > { %986 = vrot.lane.b32.xlu0 %v3122_v3, %s2931_s6 }
  0xe5   : > { %v562_v44 = vpop.permute.xlu1 %561  ;;  %v584_v49 = vsel %vm577_vm3, %v2609_v47, %v574_v42  ;;  %v582_v54 = vsel %vm577_vm3, %v2610_v48, %v568_v41 }
  0xe6   : > { %v570_v51 = vpop.permute.xlu0 %569  ;;  %2419 = vmatpush1.msk.msra.mxu0 %vm3318_vm5, %v584_v49 }
  0xe7   : > { %980 = vrot.lane.b32.xlu1 %v3132_v5, %s2931_s6  ;;  %v583_v52 = vsel %vm577_vm3, %v568_v41, %v570_v51 }
  0xe8   : > { %984 = vrot.lane.b32.xlu0 %v3112_v1, %s2931_s6  ;;  %2420 = vmatprep.subr.msk.mxu0 %vm3303_vm4, %v583_v52 }
  0xe9   : > { %v2613_v50 = vpop.permute.xlu1 %2612  ;;  %2421 = vmatpush1.msk.msra.mxu0 %vm3318_vm5, %v582_v54 }
  0xea   : > { %v2614_v53 = vunpack.i.l.bf16 %v2613_v50  ;;  %v564_v56 = vpop.permute.xlu0 %563  ;;  %v2615_v57 = vunpack.i.h.bf16 %v2613_v50 }
  0xeb   : > { %974 = vrot.lane.b32.xlu1 %v3139_v6, %s2931_s6  ;;  %v581_v58 = vsel %vm577_vm3, %v562_v44, %v564_v56 }
  0xec   : > { %978 = vrot.lane.b32.xlu0 %v3115_v2, %s2931_s6  ;;  %2422 = vmatprep.subr.msk.mxu0 %vm3303_vm4, %v581_v58  ;;  %v580_v59 = vsel %vm577_vm3, %v2614_v53, %v562_v44 }
  0xed   : > { %v558_v55 = vpop.permute.xlu1 %557  ;;  %2423 = vmatpush1.msk.msra.mxu0 %vm3318_vm5, %v580_v59 }
  0xee   : > { %v556_v61 = vpop.permute.xlu0 %555 }
  0xef   : > { %972 = vrot.lane.b32.xlu1 %v3125_v4, %s2931_s6  ;;  %v579_v62 = vsel %vm577_vm3, %v556_v61, %v558_v55  ;;  %v578_v63 = vsel %vm577_vm3, %v2615_v57, %v556_v61 }
  0xf0   : > { %2672 = vrot.lane.b32.xlu0 %v4105_v0, %s2931_s6  ;;  %2424 = vmatprep.subr.msk.mxu0 %vm3303_vm4, %v579_v62 }
  0xf1   : > { %v499_v60 = vpop.permute.xlu1 %498  ;;  %2425 = vmatpush1.msk.msra.mxu0 %vm3318_vm5, %v578_v63 }
  0xf2   : > { %v497_v10 = vpop.permute.xlu0 %496 }
  0xf3   : > { %966 = vrot.lane.b32.xlu1 %v3149_v8, %s2931_s6  ;;  %v508_v11 = vsel %vm500_vm6, %v497_v10, %v499_v60 }
  0xf4   : > { %968 = vrot.lane.b32.xlu0 %v3142_v7, %s2931_s6  ;;  %1144 = vmatprep.subr.mxu0 %v508_v11 }
  0xf5   : > { %v491_v9 = vpop.permute.xlu1 %490 }
  0xf6   : > { %v2618_v13 = vpop.permute.xlu0 %2617 }
  0xf7   : > { %v2619_v16 = vunpack.i.l.bf16 %v2618_v13  ;;  %v2620_v19 = vunpack.i.h.bf16 %v2618_v13  ;;  %1107 = vperm.xlu1 %2677, %v345_v15  }
  0xf8   : > { %1112 = vperm.xlu0 %2676, %v346_v14  }
  0xf9   : > { %v485_v12 = vpop.permute.xlu1 %484  ;;  %v507_v20 = vsel %vm500_vm6, %v2619_v16, %v497_v10  ;;  %v505_v28 = vsel %vm500_vm6, %v2620_v19, %v491_v9 }
  0xfa   : > { %v493_v24 = vpop.permute.xlu0 %492  ;;  %1145 = vmatpush1.msra.mxu0 %v507_v20 }
  0xfb   : > { %v506_v26 = vsel %vm500_vm6, %v491_v9, %v493_v24  ;;  %1102 = vperm.xlu1 %2677, %v344_v25  }
  0xfc   : > { %1146 = vmatprep.subr.mxu0 %v506_v26  ;;  %1097 = vperm.xlu0 %2676, %v343_v22  }
  0xfd   : > { %v2623_v23 = vpop.permute.xlu1 %2622  ;;  %1147 = vmatpush1.msra.mxu0 %v505_v28 }
  0xfe   : > { %v2624_v27 = vunpack.i.l.bf16 %v2623_v23  ;;  %v487_v30 = vpop.permute.xlu0 %486  ;;  %v2625_v31 = vunpack.i.h.bf16 %v2623_v23 }
  0xff   : > { %v504_v32 = vsel %vm500_vm6, %v485_v12, %v487_v30  ;;  %2679 = vrot.lane.b32.xlu1 %v4105_v0, %s2924_s26 }
 0x100   : > { %1148 = vmatprep.subr.mxu0 %v504_v32  ;;  %v503_v33 = vsel %vm500_vm6, %v2624_v27, %v485_v12  ;;  %2684 = vrot.lane.b32.xlu0 %v4105_v0, %s2924_s26 }
 0x101   : > { %v481_v29 = vpop.permute.xlu1 %480  ;;  %1149 = vmatpush1.msra.mxu0 %v503_v33 }
 0x102   : > { %v479_v35 = vpop.permute.xlu0 %478 }
 0x103   : > { %v502_v36 = vsel %vm500_vm6, %v479_v35, %v481_v29  ;;  %v501_v37 = vsel %vm500_vm6, %v2625_v31, %v479_v35  ;;  %2689 = vrot.lane.b32.xlu1 %v4105_v0, %s2925_s24 }
 0x104   : > { %1150 = vmatprep.subr.mxu0 %v502_v36  ;;  %2694 = vrot.lane.b32.xlu0 %v4105_v0, %s2925_s24 }
 0x105   : > { %v418_v34 = vpop.permute.xlu1 %417  ;;  %1151 = vmatpush1.msra.mxu0 %v501_v37 }
 0x106   : > { %v416_v39 = vpop.permute.xlu0 %415 }
 0x107   : > { %v427_v41 = vsel %vm419_vm7, %v416_v39, %v418_v34  ;;  %2699 = vrot.lane.b32.xlu1 %v4105_v0, %s2926_s8 }
 0x108   : > { %2426 = vmatprep.subr.msk.mxu0 %vm3259_vm0, %v427_v41  ;;  %2704 = vrot.lane.b32.xlu0 %v4105_v0, %s2926_s8 }
 0x109   : > { %v410_v38 = vpop.permute.xlu1 %409 }
 0x10a   : > { %v2628_v43 = vpop.permute.xlu0 %2627 }
 0x10b   : > { %v2629_v44 = vunpack.i.l.bf16 %v2628_v43  ;;  %v2630_v45 = vunpack.i.h.bf16 %v2628_v43  ;;  %2709 = vrot.lane.b32.xlu1 %v4105_v0, %s2927_s10 }
 0x10c   : > { %2714 = vrot.lane.b32.xlu0 %v4105_v0, %s2927_s10 }
 0x10d   : > { %v404_v42 = vpop.permute.xlu1 %403  ;;  %v426_v47 = vsel %vm419_vm7, %v2629_v44, %v416_v39  ;;  %v424_v52 = vsel %vm419_vm7, %v2630_v45, %v410_v38 }
 0x10e   : > { %v412_v49 = vpop.permute.xlu0 %411  ;;  %2427 = vmatpush1.msk.msra.mxu0 %vm3263_vm2, %v426_v47 }
 0x10f   : > { %v425_v50 = vsel %vm419_vm7, %v410_v38, %v412_v49  ;;  %2724 = vrot.lane.b32.xlu1 %v4105_v0, %s2928_s11 }
 0x110   : > { %2428 = vmatprep.subr.msk.mxu0 %vm3259_vm0, %v425_v50  ;;  %2719 = vrot.lane.b32.xlu0 %v4105_v0, %s2928_s11 }
 0x111   : > { %v2633_v48 = vpop.permute.xlu1 %2632  ;;  %2429 = vmatpush1.msk.msra.mxu0 %vm3263_vm2, %v424_v52 }
 0x112   : > { %v2634_v51 = vunpack.i.l.bf16 %v2633_v48  ;;  %v406_v53 = vpop.permute.xlu0 %405  ;;  %v2635_v55 = vunpack.i.h.bf16 %v2633_v48 }
 0x113   : > { %v423_v56 = vsel %vm419_vm7, %v404_v42, %v406_v53 }
 0x114   : > { %2430 = vmatprep.subr.msk.mxu0 %vm3259_vm0, %v423_v56  ;;  %v422_v57 = vsel %vm419_vm7, %v2634_v51, %v404_v42 }
 0x115   : > { %v400_v54 = vpop.permute.xlu1 %399  ;;  %2431 = vmatpush1.msk.msra.mxu0 %vm3263_vm2, %v422_v57 }
 0x116   : > { %v398_v58 = vpop.permute.xlu0 %397 }
 0x117   : > { %v421_v61 = vsel %vm419_vm7, %v398_v58, %v400_v54  ;;  %v420_v62 = vsel %vm419_vm7, %v2635_v55, %v398_v58 }
 0x118   : > { %2432 = vmatprep.subr.msk.mxu0 %vm3259_vm0, %v421_v61 }
 0x119   : > { %v2638_v59 = vpop.permute.xlu1 %2637  ;;  %2433 = vmatpush1.msk.msra.mxu0 %vm3263_vm2, %v420_v62 }
 0x11a   : > { %v2639_v60 = vunpack.i.l.bf16 %v2638_v59  ;;  %v914_v63 = vpop.permute.xlu0 %913  ;;  %v2640_v11 = vunpack.i.h.bf16 %v2638_v59 }
 0x11c   : > { %v925_v10 = vsel %vm917_vm8, %v914_v63, %v2639_v60 }
 0x11d   : > { %v908_v9 = vpop.permute.xlu1 %907  ;;  %1160 = vmatprep.subr.mxu0 %v925_v10 }
 0x11e   : > { %v912_v12 = vpop.permute.xlu0 %911  ;;  %v923_v15 = vsel %vm917_vm8, %v908_v9, %v2640_v11 }
 0x11f   : > { %v924_v14 = vsel %vm917_vm8, %v912_v12, %v914_v63 }
 0x120   : > { %1161 = vmatpush2.msra.mxu0 %v924_v14 }
 0x121   : > { %v902_v13 = vpop.permute.xlu1 %901  ;;  %1162 = vmatprep.subr.mxu0 %v923_v15 }
 0x122   : > { %v906_v16 = vpop.permute.xlu0 %905 }
 0x123   : > { %v922_v19 = vsel %vm917_vm8, %v906_v16, %v908_v9 }
 0x124   : > { %1163 = vmatpush2.msra.mxu0 %v922_v19 }
 0x125   : > { %v900_v17 = vpop.permute.xlu1 %899 }
 0x126   : > { %v2643_v20 = vpop.permute.xlu0 %2642  ;;  %v920_v28 = vsel %vm917_vm8, %v900_v17, %v902_v13 }
 0x127   : > { %v2644_v23 = vunpack.i.l.bf16 %v2643_v20  ;;  %v2645_v24 = vunpack.i.h.bf16 %v2643_v20 }
 0x129   : > { %v894_v22 = vpop.permute.xlu1 %893  ;;  %v921_v25 = vsel %vm917_vm8, %v902_v13, %v2644_v23 }
 0x12a   : > { %v896_v26 = vpop.permute.xlu0 %895  ;;  %1164 = vmatprep.subr.mxu0 %v921_v25 }
 0x12b   : > { %1165 = vmatpush2.msra.mxu0 %v920_v28  ;;  %v919_v30 = vsel %vm917_vm8, %v896_v26, %v2645_v24  ;;  %v918_v31 = vsel %vm917_vm8, %v894_v22, %v896_v26 }
 0x12c   : > { %1166 = vmatprep.subr.mxu0 %v919_v30 }
 0x12d   : > { %v2648_v27 = vpop.permute.xlu1 %2647  ;;  %1167 = vmatpush2.msra.mxu0 %v918_v31  ;;  %v319_v31 = vld [vmem:[#allocation7] sm:$0xff] }
 0x12e   : > { %v2649_v29 = vunpack.i.l.bf16 %v2648_v27  ;;  %v833_v32 = vpop.permute.xlu0 %832  ;;  %v2650_v35 = vunpack.i.h.bf16 %v2648_v27 }
 0x130   : > { %v844_v34 = vsel %vm836_vm9, %v833_v32, %v2649_v29 }
 0x131   : > { %v827_v33 = vpop.permute.xlu1 %826  ;;  %2434 = vmatprep.subr.msk.mxu0 %vm3259_vm0, %v844_v34 }
 0x132   : > { %v831_v36 = vpop.permute.xlu0 %830  ;;  %v842_v39 = vsel %vm836_vm9, %v827_v33, %v2650_v35  ;;  %v325_v35 = vld [vmem:[#allocation7 + $0x30] sm:$0xff] }
 0x133   : > { %v843_v38 = vsel %vm836_vm9, %v831_v36, %v833_v32  ;;  %v329_v36 = vld [vmem:[#allocation7 + $0x50] sm:$0xff] }
 0x134   : > { %2435 = vmatpush2.msk.msra.mxu0 %vm3263_vm2, %v843_v38 }
 0x135   : > { %v821_v37 = vpop.permute.xlu1 %820  ;;  %2436 = vmatprep.subr.msk.mxu0 %vm3259_vm0, %v842_v39 }
 0x136   : > { %v825_v41 = vpop.permute.xlu0 %824 }
 0x137   : > { %v841_v43 = vsel %vm836_vm9, %v825_v41, %v827_v33 }
 0x138   : > { %2437 = vmatpush2.msk.msra.mxu0 %vm3263_vm2, %v841_v43 }
 0x139   : > { %v819_v42 = vpop.permute.xlu1 %818 }
 0x13a   : > { %v2653_v44 = vpop.permute.xlu0 %2652  ;;  %v839_v50 = vsel %vm836_vm9, %v819_v42, %v821_v37 }
 0x13b   : > { %v2654_v47 = vunpack.i.l.bf16 %v2653_v44  ;;  %v2655_v48 = vunpack.i.h.bf16 %v2653_v44  ;;  %v328_v44 = vld [vmem:[#allocation7 + $0x48] sm:$0xff] }
 0x13d   : > { %v813_v45 = vpop.permute.xlu1 %812  ;;  %v840_v49 = vsel %vm836_vm9, %v821_v37, %v2654_v47  ;;  %v324_v47 = vld [vmem:[#allocation7 + $0x28] sm:$0xff] }
 0x13e   : > { %v815_v51 = vpop.permute.xlu0 %814  ;;  %2438 = vmatprep.subr.msk.mxu0 %vm3259_vm0, %v840_v49  ;;  %v330_v49 = vld [vmem:[#allocation7 + $0x58] sm:$0xff] }
 0x13f   : > { %2439 = vmatpush2.msk.msra.mxu0 %vm3263_vm2, %v839_v50  ;;  %v838_v54 = vsel %vm836_vm9, %v815_v51, %v2655_v48  ;;  %v837_v55 = vsel %vm836_vm9, %v813_v45, %v815_v51  ;;  %v321_v45 = vld [vmem:[#allocation7 + $0x10] sm:$0xff]  ;;  %v327_v48 = vld [vmem:[#allocation7 + $0x40] sm:$0xff] }
 0x140   : > { %2440 = vmatprep.subr.msk.mxu0 %vm3259_vm0, %v838_v54 }
 0x141   : > { %v2658_v52 = vpop.permute.xlu1 %2657  ;;  %2441 = vmatpush2.msk.msra.mxu0 %vm3263_vm2, %v837_v55 }
 0x142   : > { %v2659_v53 = vunpack.i.l.bf16 %v2658_v52  ;;  %v752_v56 = vpop.permute.xlu0 %751  ;;  %v2660_v59 = vunpack.i.h.bf16 %v2658_v52 }
 0x144   : > { %v763_v58 = vsel %vm755_vm10, %v752_v56, %v2659_v53 }
 0x145   : > { %v746_v57 = vpop.permute.xlu1 %745  ;;  %2442 = vmatprep.subr.msk.mxu0 %vm3303_vm4, %v763_v58 }
 0x146   : > { %v750_v60 = vpop.permute.xlu0 %749  ;;  %v761_v63 = vsel %vm755_vm10, %v746_v57, %v2660_v59 }
 0x147   : > { %v762_v61 = vsel %vm755_vm10, %v750_v60, %v752_v56 }
 0x148   : > { %2443 = vmatpush2.msk.msra.mxu0 %vm3318_vm5, %v762_v61 }
 0x149   : > { %v740_v62 = vpop.permute.xlu1 %739  ;;  %2444 = vmatprep.subr.msk.mxu0 %vm3303_vm4, %v761_v63 }
 0x14a   : > { %v744_v9 = vpop.permute.xlu0 %743 }
 0x14b   : > { %v760_v10 = vsel %vm755_vm10, %v744_v9, %v746_v57 }
 0x14c   : > { %2445 = vmatpush2.msk.msra.mxu0 %vm3318_vm5, %v760_v10 }
 0x14d   : > { %v738_v11 = vpop.permute.xlu1 %737 }
 0x14e   : > { %v2663_v12 = vpop.permute.xlu0 %2662  ;;  %v758_v17 = vsel %vm755_vm10, %v738_v11, %v740_v62 }
 0x14f   : > { %v2664_v13 = vunpack.i.l.bf16 %v2663_v12  ;;  %v2665_v15 = vunpack.i.h.bf16 %v2663_v12 }
 0x151   : > { %v732_v14 = vpop.permute.xlu1 %731  ;;  %v759_v16 = vsel %vm755_vm10, %v740_v62, %v2664_v13 }
 0x152   : > { %v734_v19 = vpop.permute.xlu0 %733  ;;  %2446 = vmatprep.subr.msk.mxu0 %vm3303_vm4, %v759_v16 }
 0x153   : > { %2447 = vmatpush2.msk.msra.mxu0 %vm3318_vm5, %v758_v17  ;;  %v757_v22 = vsel %vm755_vm10, %v734_v19, %v2665_v15  ;;  %v756_v23 = vsel %vm755_vm10, %v732_v14, %v734_v19 }
 0x154   : > { %2448 = vmatprep.subr.msk.mxu0 %vm3303_vm4, %v757_v22 }
 0x155   : > { %v2668_v20 = vpop.permute.xlu1 %2667  ;;  %2449 = vmatpush2.msk.msra.mxu0 %vm3318_vm5, %v756_v23 }
 0x156   : > { %v2669_v24 = vunpack.i.l.bf16 %v2668_v20  ;;  %v987_v25 = vpop.permute.xlu0 %986  ;;  %1184 = vmatprep.subr.mxu0 %v3122_v3  ;;  %v2670_v28 = vunpack.i.h.bf16 %v2668_v20 }
 0x157   : > { %1185 = vmatpush2.msra.mxu0 %v3112_v1 }
 0x158   : > { %v998_v27 = vsel %vm990_vm11, %v987_v25, %v2669_v24  ;;  %1186 = vmatprep.subr.mxu0 %v3132_v5  ;;  %v323_v5 = vld [vmem:[#allocation7 + $0x20] sm:$0xff] }
 0x159   : > { %v981_v26 = vpop.permute.xlu1 %980  ;;  %2450 = vmatprep.subr.msk.mxu1 %vm3303_vm4, %v998_v27  ;;  %1187 = vmatpush2.msra.mxu0 %v3115_v2 }
 0x15a   : > { %v985_v29 = vpop.permute.xlu0 %984  ;;  %1188 = vmatprep.subr.mxu0 %v3139_v6  ;;  %v996_v1 = vsel %vm990_vm11, %v981_v26, %v2670_v28  ;;  %v322_v6 = vld [vmem:[#allocation7 + $0x18] sm:$0xff] }
 0x15b   : > { %1189 = vmatpush2.msra.mxu0 %v3125_v4  ;;  %v997_v3 = vsel %vm990_vm11, %v985_v29, %v987_v25 }
 0x15c   : > { %1190 = vmatprep.subr.mxu0 %v3142_v7  ;;  %2451 = vmatpush1.msk.msra.mxu1 %vm3318_vm5, %v997_v3  ;;  %v326_v7 = vld [vmem:[#allocation7 + $0x38] sm:$0xff] }
 0x15d   : > { %v975_v30 = vpop.permute.xlu1 %974  ;;  %1191 = vmatpush2.msra.mxu0 %v3149_v8  ;;  %2452 = vmatprep.subr.msk.mxu1 %vm3303_vm4, %v996_v1 }
 0x15e   : > { %v979_v2 = vpop.permute.xlu0 %978  ;;  %1193 = vmatmul.mubr.f32.vlgmr.msra.gmra.mxu0 %v319_v31 }
 0x15f   : > { %v995_v4 = vsel %vm990_vm11, %v979_v2, %v981_v26  ;;  %1198 = vmatprep.mubr.f32.mxu0 %v323_v5 }
 0x160   : > { %2453 = vmatpush1.msk.msra.mxu1 %vm3318_vm5, %v995_v4 }
 0x161   : > { %v973_v32 = vpop.permute.xlu1 %972 }
 0x162   : > { %v2673_v33 = vpop.permute.xlu0 %2672  ;;  %1199 = vmatmul.mubr.f32.gmra.mxu0 %v322_v6  ;;  %v993_v39 = vsel %vm990_vm11, %v973_v32, %v975_v30 }
 0x163   : > { %v2674_v34 = vunpack.i.l.bf16 %v2673_v33  ;;  %1204 = vmatprep.mubr.f32.mxu0 %v326_v7  ;;  %v2675_v37 = vunpack.i.h.bf16 %v2673_v33 }
 0x165   : > { %v967_v8 = vpop.permute.xlu1 %966  ;;  %v994_v38 = vsel %vm990_vm11, %v975_v30, %v2674_v34 }
 0x166   : > { %v969_v41 = vpop.permute.xlu0 %968  ;;  %1205 = vmatmul.mubr.f32.gmra.mxu0 %v325_v35  ;;  %2454 = vmatprep.subr.msk.mxu1 %vm3303_vm4, %v994_v38 }
 0x167   : > { %v991_v42 = vsel %vm990_vm11, %v967_v8, %v969_v41  ;;  %v992_v43 = vsel %vm990_vm11, %v969_v41, %v2675_v37  ;;  %2455 = vmatpush1.msk.msra.mxu1 %vm3318_vm5, %v993_v39  ;;  %1210 = vmatprep.mubr.f32.mxu0 %v329_v36 }
 0x168   : > { %2456 = vmatprep.subr.msk.mxu1 %vm3303_vm4, %v992_v43 }
 0x169   : > { %2457 = vmatpush1.msk.msra.mxu1 %vm3318_vm5, %v991_v42 }
 0x16a   : > { %1211 = vmatmul.mubr.f32.gmra.mxu0 %v328_v44  ;;  %2395 = vmatmul.mubr.msk.f32.vlgmr.msra.gmra.mxu1 %vm1115_vm12, %v321_v45 }
 0x16b   : > { %1287 = vmatprep.mubr.f32.mxu1 %v4105_v0  ;;  %2227 = vmatprep.mubr.f32.mxu0 %v4105_v0 }
 0x16e   : > { %2396 = vmatmul.mubr.msk.f32.gmra.mxu1 %vm1115_vm12, %v324_v47 }
 0x16f   : > { %1293 = vmatprep.mubr.f32.mxu1 %v4105_v0 }
 0x172   : > { %2397 = vmatmul.mubr.msk.f32.gmra.mxu1 %vm1115_vm12, %v327_v48  ;;  %v1108_v61 = vpop.permute.xlu1 %1107 }
 0x173   : > { %1299 = vmatprep.mubr.f32.mxu1 %v4105_v0  ;;  %v3521_v50 = vpop.permute.xlu0 %1112 }
 0x176   : > { %2398 = vmatmul.mubr.msk.f32.gmra.mxu1 %vm1115_vm12, %v330_v49  ;;  %v1103_v11 = vpop.permute.xlu1 %1102 }
 0x177   : > { %v1098_v52 = vpop.permute.xlu0 %1097 }
 0x17a   : > { %v3629_v42 = vpop.permute.xlu1 %2679 }
 0x17b   : > { %v3631_v43 = vpop.permute.xlu0 %2684 }
 0x17e   : > { %v3637_v44 = vpop.permute.xlu1 %2689 }
 0x17f   : > { %v3639_v45 = vpop.permute.xlu0 %2694 }
 0x182   : > { %v3649_v47 = vpop.permute.xlu1 %2699 }
 0x183   : > { %v3651_v48 = vpop.permute.xlu0 %2704 }
 0x186   : > { %v3657_v49 = vpop.permute.xlu1 %2709 }
 0x21e   : > { %v1194_v51 = vpop.f32.mrf.mxu0 }
 0x21f   : > { %v1195_v53 = vadd.f32 %v1194_v51, %v1098_v52  ;;  %v3669_v51 = vpop.permute.xlu1 %2724 }
 0x220   : > { %v1196_v54 = vpop.f32.mrf.mxu0 }
 0x221   : > { %v1197_v56 = vadd.f32 %v1196_v54, %v1098_v52 }
 0x222   : > { %v1200_v9 = vpop.f32.mrf.mxu0 }
 0x223   : > { %v1201_v14 = vadd.f32 %v1200_v9, %v1103_v11  ;;  %v2707_v9 = vunpack.i.h.bf16 %v3651_v48 }
 0x224   : > { %v1202_v12 = vpop.f32.mrf.mxu0 }
 0x225   : > { %v1203_v15 = vadd.f32 %v1202_v12, %v1103_v11 }
 0x226   : > { %v1206_v25 = vpop.f32.mrf.mxu0 }
 0x227   : > { %v1207_v26 = vadd.f32 %v1206_v25, %v1108_v61 }
 0x228   : > { %v1208_v27 = vpop.f32.mrf.mxu0 }
 0x229   : > { %v1209_v29 = vadd.f32 %v1208_v27, %v1108_v61 }
 0x22a   : > { %v1283_v55 = vpop.f32.mrf.mxu1  ;;  %v1212_v6 = vpop.f32.mrf.mxu0 }
 0x22b   : > { %v1284_v57 = vadd.f32 %v1283_v55, %v1195_v53  ;;  %v1213_v7 = vadd.f32 %v1212_v6, %v3521_v50  ;;  %v2687_v53 = vunpack.i.h.bf16 %v3631_v43  ;;  %v349_v6 = vld [vmem:[%s4098_s4 + $0x10] sm:$0xff] }
 0x22c   : > { %v1285_v58 = vpop.f32.mrf.mxu1  ;;  %v1214_v34 = vpop.f32.mrf.mxu0 }
 0x22d   : > { %v1306_v59 = vmul.f32 0.2, %v1284_v57  ;;  %v1286_v60 = vadd.f32 %v1285_v58, %v1197_v56  ;;  %v1215_v36 = vadd.f32 %v1214_v34, %v3521_v50  ;;  %v3659_v50 = vpop.permute.xlu0 %2714  ;;  %v332_v56 = vld [vmem:[#allocation9 + $0x8] sm:$0xff]  ;;  %v2697_v58 = vunpack.i.h.bf16 %v3639_v45 }
 0x22e   : > { %v1289_v13 = vpop.f32.mrf.mxu1  ;;  %2138 = vmatprep.mubr.f32.mxu1 %v332_v56 }
 0x22f   : > { %v3523_v62 = vmax.f32 %v1284_v57, %v1306_v59  ;;  %v1307_v63 = vmul.f32 0.2, %v1286_v60  ;;  %v1290_v17 = vadd.f32 %v1289_v13, %v1201_v14 }
 0x230   : > { %v1291_v16 = vpop.f32.mrf.mxu1 }
 0x231   : > { %1842 = vrot.lane.b32.xlu0 %v3523_v62, %s2928_s11  ;;  %1588 = vrot.lane.b32.xlu1 %v3523_v62, %s2924_s26  ;;  %v3529_v10 = vmax.f32 %v1286_v60, %v1307_v63  ;;  %v1292_v19 = vadd.f32 %v1291_v16, %v1203_v15  ;;  %v1308_v20 = vmul.f32 0.2, %v1290_v17  ;;  %v3671_v52 = vpop.permute.xlu0 %2719  ;;  %v2717_v15 = vunpack.i.h.bf16 %v3659_v50 }
 0x232   : > { %v1295_v28 = vpop.f32.mrf.mxu1 }
 0x233   : > { %v1309_v22 = vmul.f32 0.2, %v1292_v19  ;;  %v3547_v23 = vmax.f32 %v1290_v17, %v1308_v20  ;;  %v1296_v30 = vadd.f32 %v1295_v28, %v1207_v26 }
 0x234   : > { %v1297_v3 = vpop.f32.mrf.mxu1 }
 0x235   : > { %1590 = vrot.lane.b32.xlu0 %v3529_v10, %s2924_s26  ;;  %1508 = vrot.lane.b32.xlu1 %v3523_v62, %s2925_s24  ;;  %v3549_v24 = vmax.f32 %v1292_v19, %v1309_v22  ;;  %v1310_v31 = vmul.f32 0.2, %v1296_v30  ;;  %v1298_v1 = vadd.f32 %v1297_v3, %v1209_v29  ;;  %v347_v3 = vld [vmem:[%s4098_s4] sm:$0xff] }
 0x236   : > { %v1301_v32 = vpop.f32.mrf.mxu1 }
 0x237   : > { %v3567_v5 = vmax.f32 %v1296_v30, %v1310_v31  ;;  %v1311_v2 = vmul.f32 0.2, %v1298_v1  ;;  %v1302_v33 = vadd.f32 %v1301_v32, %v1213_v7  ;;  %v348_v30 = vld [vmem:[%s4098_s4 + $0x8] sm:$0xff] }
 0x238   : > { %v1303_v8 = vpop.f32.mrf.mxu1 }
 0x239   : > { %1510 = vrot.lane.b32.xlu0 %v3529_v10, %s2925_s24  ;;  %1436 = vrot.lane.b32.xlu1 %v3523_v62, %s2926_s8  ;;  %v3573_v4 = vmax.f32 %v1298_v1, %v1311_v2  ;;  %v1312_v35 = vmul.f32 0.2, %v1302_v33  ;;  %v1304_v38 = vadd.f32 %v1303_v8, %v1215_v36  ;;  %v350_v2 = vld [vmem:[%s4098_s4 + $0x18] sm:$0xff] }
 0x23b   : > { %v3593_v37 = vmax.f32 %v1302_v33, %v1312_v35  ;;  %v1313_v39 = vmul.f32 0.2, %v1304_v38 }
 0x23d   : > { %1438 = vrot.lane.b32.xlu0 %v3529_v10, %s2926_s8  ;;  %1356 = vrot.lane.b32.xlu1 %v3523_v62, %s2927_s10  ;;  %v3603_v41 = vmax.f32 %v1304_v38, %v1313_v39 }
 0x241   : > { %1358 = vrot.lane.b32.xlu0 %v3529_v10, %s2927_s10  ;;  %1844 = vrot.lane.b32.xlu1 %v3529_v10, %s2928_s11 }
 0x245   : > { %1594 = vrot.lane.b32.xlu0 %v3547_v23, %s2924_s26  ;;  %1596 = vrot.lane.b32.xlu1 %v3549_v24, %s2924_s26 }
 0x249   : > { %1514 = vrot.lane.b32.xlu0 %v3547_v23, %s2925_s24  ;;  %1516 = vrot.lane.b32.xlu1 %v3549_v24, %s2925_s24 }
 0x24d   : > { %1442 = vrot.lane.b32.xlu0 %v3547_v23, %s2926_s8  ;;  %1444 = vrot.lane.b32.xlu1 %v3549_v24, %s2926_s8 }
 0x251   : > { %1362 = vrot.lane.b32.xlu0 %v3547_v23, %s2927_s10  ;;  %1364 = vrot.lane.b32.xlu1 %v3549_v24, %s2927_s10 }
 0x255   : > { %1848 = vrot.lane.b32.xlu0 %v3547_v23, %s2928_s11  ;;  %1854 = vrot.lane.b32.xlu1 %v3567_v5, %s2928_s11 }
 0x259   : > { %1850 = vrot.lane.b32.xlu0 %v3549_v24, %s2928_s11  ;;  %1602 = vrot.lane.b32.xlu1 %v3573_v4, %s2924_s26 }
 0x25d   : > { %1600 = vrot.lane.b32.xlu0 %v3567_v5, %s2924_s26  ;;  %1522 = vrot.lane.b32.xlu1 %v3573_v4, %s2925_s24 }
 0x261   : > { %1520 = vrot.lane.b32.xlu0 %v3567_v5, %s2925_s24  ;;  %1450 = vrot.lane.b32.xlu1 %v3573_v4, %s2926_s8 }
 0x265   : > { %1448 = vrot.lane.b32.xlu0 %v3567_v5, %s2926_s8  ;;  %1370 = vrot.lane.b32.xlu1 %v3573_v4, %s2927_s10 }
 0x269   : > { %1368 = vrot.lane.b32.xlu0 %v3567_v5, %s2927_s10  ;;  %1606 = vrot.lane.b32.xlu1 %v3593_v37, %s2924_s26 }
 0x26d   : > { %1856 = vrot.lane.b32.xlu0 %v3573_v4, %s2928_s11  ;;  %1526 = vrot.lane.b32.xlu1 %v3593_v37, %s2925_s24 }
 0x271   : > { %1608 = vrot.lane.b32.xlu0 %v3603_v41, %s2924_s26  ;;  %1454 = vrot.lane.b32.xlu1 %v3593_v37, %s2926_s8  ;;  %s2277_s26 = scalar_lea.sflag [#allocation6], %s3092_s16 }
 0x275   : > { %2729 = vrot.lane.b32.xlu0 %v4105_v0, %s2929_s12  ;;  %1374 = vrot.lane.b32.xlu1 %v3593_v37, %s2927_s10 }
 0x279   : > { %1528 = vrot.lane.b32.xlu0 %v3603_v41, %s2925_s24  ;;  %1860 = vrot.lane.b32.xlu1 %v3593_v37, %s2928_s11 }
 0x27d   : > { %1776 = vrot.lane.b32.xlu0 %v3573_v4, %s2929_s12  ;;  %1780 = vrot.lane.b32.xlu1 %v3593_v37, %s2929_s12 }
 0x281   : > { %1456 = vrot.lane.b32.xlu0 %v3603_v41, %s2926_s8  ;;  %1774 = vrot.lane.b32.xlu1 %v3567_v5, %s2929_s12 }
 0x285   : > { %1770 = vrot.lane.b32.xlu0 %v3549_v24, %s2929_s12  ;;  %2734 = vrot.lane.b32.xlu1 %v4105_v0, %s2929_s12 }
 0x289   : > { %1376 = vrot.lane.b32.xlu0 %v3603_v41, %s2927_s10  ;;  %1764 = vrot.lane.b32.xlu1 %v3529_v10, %s2929_s12  ;;  %s2933_s10 = smov [#allocation10]  }
 0x28d   : > { %1768 = vrot.lane.b32.xlu0 %v3547_v23, %s2929_s12  ;;  %1700 = vrot.lane.b32.xlu1 %v3593_v37, %s2930_s28 }
 0x291   : > { %1762 = vrot.lane.b32.xlu0 %v3523_v62, %s2929_s12  ;;  %1862 = vrot.lane.b32.xlu1 %v3603_v41, %s2928_s11  ;;  %s2850_s11 = sshll.u32 %s2933_s10, 4  ;;  %s2851_s11 = int_to_ptr.vmem [resolvable:$false] %s2850_s11 }
 0x295   : > { %2739 = vrot.lane.b32.xlu0 %v4105_v0, %s2930_s28  ;;  %1694 = vrot.lane.b32.xlu1 %v3567_v5, %s2930_s28 }
 0x299   : > { %1696 = vrot.lane.b32.xlu0 %v3573_v4, %s2930_s28  ;;  %1782 = vrot.lane.b32.xlu1 %v3603_v41, %s2929_s12  ;;  %s2852_s12 = scalar_lea.vmem %s2851_s11, 2048 }
 0x29d   : > { %1690 = vrot.lane.b32.xlu0 %v3549_v24, %s2930_s28  ;;  %2744 = vrot.lane.b32.xlu1 %v4105_v0, %s2930_s28 }
 0x2a1   : > { %1688 = vrot.lane.b32.xlu0 %v3547_v23, %s2930_s28  ;;  %1702 = vrot.lane.b32.xlu1 %v3603_v41, %s2930_s28 }
 0x2a3   : > { %v1843_v54 = vpop.permute.xlu0 %1842  ;;  %v1589_v55 = vpop.permute.xlu1 %1588 }
 0x2a4   : > { %v3679_v57 = vsel %vm658_vm1, %v2687_v53, %v1589_v55 }
 0x2a5   : > { %1682 = vrot.lane.b32.xlu0 %v3523_v62, %s2930_s28  ;;  %1684 = vrot.lane.b32.xlu1 %v3529_v10, %s2930_s28 }
 0x2a7   : > { %v1591_v59 = vpop.permute.xlu0 %1590  ;;  %v1509_v60 = vpop.permute.xlu1 %1508 }
 0x2a8   : > { %v3687_v61 = vsel %vm658_vm1, %v1589_v55, %v1591_v59  ;;  %v3690_v63 = vsel %vm577_vm3, %v2697_v58, %v1509_v60 }
 0x2a9   : > { %2749 = vrot.lane.b32.xlu0 %v4105_v0, %s2931_s6  ;;  %1932 = vrot.lane.b32.xlu1 %v3593_v37, %s2931_s6 }
 0x2ab   : > { %v1511_v11 = vpop.permute.xlu0 %1510  ;;  %v1437_v12 = vpop.permute.xlu1 %1436 }
 0x2ac   : > { %v3698_v13 = vsel %vm577_vm3, %v1509_v60, %v1511_v11  ;;  %v3701_v14 = vsel %vm500_vm6, %v2707_v9, %v1437_v12 }
 0x2ad   : > { %1928 = vrot.lane.b32.xlu0 %v3573_v4, %s2931_s6  ;;  %1926 = vrot.lane.b32.xlu1 %v3567_v5, %s2931_s6 }
 0x2af   : > { %v1439_v16 = vpop.permute.xlu0 %1438  ;;  %v1357_v17 = vpop.permute.xlu1 %1356 }
 0x2b0   : > { %v3709_v19 = vsel %vm419_vm7, %v2717_v15, %v1357_v17  ;;  %v3712_v20 = vsel %vm500_vm6, %v1437_v12, %v1439_v16  ;;  %v2681_v12 = vunpack.i.l.bf16 %v3629_v42 }
 0x2b1   : > { %1922 = vrot.lane.b32.xlu0 %v3549_v24, %s2931_s6  ;;  %1934 = vrot.lane.b32.xlu1 %v3603_v41, %s2931_s6 }
 0x2b3   : > { %v1359_v22 = vpop.permute.xlu0 %1358  ;;  %v3718_v25 = vpop.permute.xlu1 %1844 }
 0x2b4   : > { %v3721_v26 = vsel %vm419_vm7, %v1357_v17, %v1359_v22  ;;  %v3725_v27 = vsel %vm917_vm8, %v1843_v54, %v3718_v25  ;;  %v2682_v22 = vunpack.i.h.bf16 %v3629_v42 }
 0x2b5   : > { %1920 = vrot.lane.b32.xlu0 %v3547_v23, %s2931_s6  ;;  %2754 = vrot.lane.b32.xlu1 %v4105_v0, %s2931_s6 }
 0x2b7   : > { %v1595_v28 = vpop.permute.xlu0 %1594  ;;  %v1597_v29 = vpop.permute.xlu1 %1596 }
 0x2b9   : > { %1914 = vrot.lane.b32.xlu0 %v3523_v62, %s2931_s6  ;;  %1916 = vrot.lane.b32.xlu1 %v3529_v10, %s2931_s6  ;;  %s4127_s6 = sshll.u32 %s3092_s16, 6 }
 0x2ba   : > { %s4026_s14 = scalar_lea.vmem [#allocation10], %s4127_s6 }
 0x2bb   : > { %v3741_v31 = vpop.permute.xlu0 %1514  ;;  %v1517_v1 = vpop.permute.xlu1 %1516  ;;  %s2290_s29 = sshll.u32 %s4026_s14, 4  ;;  %s4040_s29 = int_to_ptr.vmem [resolvable:$true] %s2290_s29 }
 0x2bc   : > { %s2846_s24 = scalar_lea.vmem %s4040_s29, 1024  ;;  %p2853_p6 = scmp.lt.s32.totalorder %s4040_s29, %s2851_s11 }
 0x2bd   : > { %2049 = vperm.xlu0 %2676, %v348_v30   ;;  %2044 = vperm.xlu1 %2677, %v347_v3   ;;  %p2847_p11 = scmp.ne.s32.totalorder %s4040_s29, %s2846_s24  ;;  %p2854_p12 = scmp.lt.s32.totalorder %s2852_s12, %s2846_s24 }
 0x2bf   : > { %v3749_v32 = vpop.permute.xlu0 %1442  ;;  %v3751_v7 = vpop.permute.xlu1 %1444  ;;  %p2848_p1 = pnand %p2847_p11, %p4128_p10  ;;  %p2855_p7 = por %p2854_p12, %p2853_p6 }
 0x2c1   : > { %2059 = vperm.xlu0 %2676, %v350_v2   ;;  %2054 = vperm.xlu1 %2677, %v349_v6   ;;  %v2686_v2 = vunpack.i.l.bf16 %v3631_v43  ;;  %v2691_v43 = vunpack.i.l.bf16 %v3637_v44  ;;  %p2849_p2 = pneg %p2848_p1 }
 0x2c3   : > { %v3753_v33 = vpop.permute.xlu0 %1362  ;;  %v3755_v34 = vpop.permute.xlu1 %1364  ;;  %p2856_p9 = pnand %p2855_p7, %p2849_p2 }
 0x2c7   : > { %v3757_v35 = vpop.permute.xlu0 %1848  ;;  %v3759_v8 = vpop.permute.xlu1 %1854 }
 0x2cb   : > { %v3761_v36 = vpop.permute.xlu0 %1850  ;;  %v1603_v38 = vpop.permute.xlu1 %1602 }
 0x2cf   : > { %v1601_v39 = vpop.permute.xlu0 %1600  ;;  %v1523_v53 = vpop.permute.xlu1 %1522 }
 0x2d0   : > { %v1615_v3 = vsel %vm658_vm1, %v1601_v39, %v1603_v38  ;;  %v1614_v6 = vsel %vm658_vm1, %v2682_v22, %v1601_v39  ;;  %v1612_v38 = vsel %vm658_vm1, %v2686_v2, %v1595_v28 }
 0x2d3   : > { %v1521_v54 = vpop.permute.xlu0 %1520  ;;  %v1451_v55 = vpop.permute.xlu1 %1450 }
 0x2d7   : > { %v1449_v56 = vpop.permute.xlu0 %1448  ;;  %v3763_v58 = vpop.permute.xlu1 %1370 }
 0x2d8   : > { %v1463_v2 = vsel %vm500_vm6, %v1449_v56, %v1451_v55  ;;  %v2711_v55 = vunpack.i.l.bf16 %v3657_v49 }
 0x2db   : > { %v3765_v59 = vpop.permute.xlu0 %1368  ;;  %v1607_v60 = vpop.permute.xlu1 %1606 }
 0x2dc   : > { %v1616_v30 = vsel %vm658_vm1, %v2681_v12, %v1607_v60 }
 0x2df   : > { %v3767_v9 = vpop.permute.xlu0 %1856  ;;  %v1527_v11 = vpop.permute.xlu1 %1526 }
 0x2e3   : > { %v1609_v15 = vpop.permute.xlu0 %1608  ;;  %v1455_v16 = vpop.permute.xlu1 %1454 }
 0x2e4   : > { %v1617_v17 = vsel %vm658_vm1, %v1607_v60, %v1609_v15  ;;  %v1613_v60 = vsel %vm658_vm1, %v1595_v28, %v1597_v29  ;;  %v2692_v28 = vunpack.i.h.bf16 %v3637_v44  ;;  %v1536_v15 = vsel %vm577_vm3, %v2691_v43, %v1527_v11 }
 0x2e5   : > { %2458 = vmatprep.subr.msk.mxu1 %vm3259_vm0, %v1617_v17  ;;  %v1535_v17 = vsel %vm577_vm3, %v1521_v54, %v1523_v53  ;;  %v2712_v43 = vunpack.i.h.bf16 %v3657_v49 }
 0x2e6   : > { %2459 = vmatpush1.msk.msra.mxu1 %vm3263_vm2, %v1616_v30  ;;  %v1534_v22 = vsel %vm577_vm3, %v2692_v28, %v1521_v54 }
 0x2e7   : > { %v3780_v0 = vpop.permute.xlu0 %2729  ;;  %2460 = vmatprep.subr.msk.mxu1 %vm3259_vm0, %v1615_v3  ;;  %v1375_v42 = vpop.permute.xlu1 %1374 }
 0x2e8   : > { %2461 = vmatpush1.msk.msra.mxu1 %vm3263_vm2, %v1614_v6  ;;  %v2706_v6 = vunpack.i.l.bf16 %v3651_v48 }
 0x2e9   : > { %2462 = vmatprep.subr.msk.mxu1 %vm3259_vm0, %v1613_v60 }
 0x2ea   : > { %2463 = vmatpush1.msk.msra.mxu1 %vm3263_vm2, %v1612_v38 }
 0x2eb   : > { %v1529_v39 = vpop.permute.xlu0 %1528  ;;  %2464 = vmatprep.subr.msk.mxu1 %vm3259_vm0, %v3687_v61  ;;  %v3796_v12 = vpop.permute.xlu1 %1860  ;;  %v2696_v61 = vunpack.i.l.bf16 %v3639_v45  ;;  %v2701_v45 = vunpack.i.l.bf16 %v3649_v47 }
 0x2ec   : > { %v1537_v29 = vsel %vm577_vm3, %v1527_v11, %v1529_v39  ;;  %2465 = vmatpush1.msk.msra.mxu1 %vm3263_vm2, %v3679_v57  ;;  %v1533_v57 = vsel %vm577_vm3, %v3741_v31, %v1517_v1  ;;  %v2702_v11 = vunpack.i.h.bf16 %v3649_v47  ;;  %v1461_v47 = vsel %vm500_vm6, %v3749_v32, %v3751_v7 }
 0x2ed   : > { %2466 = vmatprep.subr.msk.mxu1 %vm3303_vm4, %v1537_v29  ;;  %v1532_v53 = vsel %vm577_vm3, %v2696_v61, %v3741_v31  ;;  %v1464_v3 = vsel %vm500_vm6, %v2701_v45, %v1455_v16  ;;  %v1384_v7 = vsel %vm419_vm7, %v2711_v55, %v1375_v42  ;;  %v1382_v39 = vsel %vm419_vm7, %v2712_v43, %v3765_v59 }
 0x2ee   : > { %2467 = vmatpush1.msk.msra.mxu1 %vm3318_vm5, %v1536_v15  ;;  %v2722_v29 = vunpack.i.h.bf16 %v3671_v52  ;;  %v2726_v15 = vunpack.i.l.bf16 %v3669_v51  ;;  %v2727_v61 = vunpack.i.h.bf16 %v3669_v51  ;;  %v2732_v51 = vunpack.i.h.bf16 %v3780_v0 }
 0x2ef   : > { %v3811_v30 = vpop.permute.xlu0 %1776  ;;  %2468 = vmatprep.subr.msk.mxu1 %vm3303_vm4, %v1535_v17  ;;  %v3815_v44 = vpop.permute.xlu1 %1780 }
 0x2f0   : > { %2469 = vmatpush1.msk.msra.mxu1 %vm3318_vm5, %v1534_v22  ;;  %v1871_v17 = vsel %vm917_vm8, %v3767_v9, %v2722_v29  ;;  %v1868_v22 = vsel %vm917_vm8, %v3757_v35, %v3761_v36  ;;  %v338_v29 = vld [vmem:[#allocation9 + $0x38] sm:$0xff] }
 0x2f1   : > { %2470 = vmatprep.subr.msk.mxu1 %vm3303_vm4, %v1533_v57  ;;  %v2731_v57 = vunpack.i.l.bf16 %v3780_v0 }
 0x2f2   : > { %2471 = vmatpush1.msk.msra.mxu1 %vm3318_vm5, %v1532_v53 }
 0x2f3   : > { %v1457_v54 = vpop.permute.xlu0 %1456  ;;  %2472 = vmatprep.subr.msk.mxu1 %vm3303_vm4, %v3698_v13  ;;  %v3831_v1 = vpop.permute.xlu1 %1774  ;;  %v1462_v13 = vsel %vm500_vm6, %v2702_v11, %v1449_v56 }
 0x2f4   : > { %2473 = vmatpush1.msk.msra.mxu1 %vm3318_vm5, %v3690_v63  ;;  %v1465_v31 = vsel %vm500_vm6, %v1455_v16, %v1457_v54  ;;  %v1460_v63 = vsel %vm500_vm6, %v2706_v6, %v3749_v32  ;;  %v1383_v32 = vsel %vm419_vm7, %v3765_v59, %v3763_v58  ;;  %v1790_v0 = vsel %vm836_vm9, %v3831_v1, %v3811_v30 }
 0x2f5   : > { %2090 = vmatprep.subr.mxu1 %v1465_v31 }
 0x2f6   : > { %2091 = vmatpush1.msra.mxu1 %v1464_v3 }
 0x2f7   : > { %v3842_v60 = vpop.permute.xlu0 %1770  ;;  %2092 = vmatprep.subr.mxu1 %v1463_v2  ;;  %v3844_v38 = vpop.permute.xlu1 %2734 }
 0x2f8   : > { %2093 = vmatpush1.msra.mxu1 %v1462_v13  ;;  %v2736_v45 = vunpack.i.l.bf16 %v3844_v38 }
 0x2f9   : > { %2094 = vmatprep.subr.mxu1 %v1461_v47 }
 0x2fa   : > { %2095 = vmatpush1.msra.mxu1 %v1460_v63 }
 0x2fb   : > { %v1377_v48 = vpop.permute.xlu0 %1376  ;;  %2096 = vmatprep.subr.mxu1 %v3712_v20  ;;  %v3853_v56 = vpop.permute.xlu1 %1764  ;;  %v2716_v20 = vunpack.i.l.bf16 %v3659_v50  ;;  %v2721_v50 = vunpack.i.l.bf16 %v3671_v52  ;;  %v1870_v52 = vsel %vm917_vm8, %v3759_v8, %v3767_v9  ;;  %v1867_v8 = vsel %vm917_vm8, %v3718_v25, %v2727_v61 }
 0x2fc   : > { %v1385_v16 = vsel %vm419_vm7, %v1375_v42, %v1377_v48  ;;  %2097 = vmatpush1.msra.mxu1 %v3701_v14  ;;  %v1381_v42 = vsel %vm419_vm7, %v3753_v33, %v3755_v34  ;;  %v1791_v25 = vsel %vm836_vm9, %v3811_v30, %v2732_v51 }
 0x2fd   : > { %2474 = vmatprep.subr.msk.mxu1 %vm3259_vm0, %v1385_v16  ;;  %v1380_v58 = vsel %vm419_vm7, %v2716_v20, %v3753_v33 }
 0x2fe   : > { %2475 = vmatpush1.msk.msra.mxu1 %vm3263_vm2, %v1384_v7 }
 0x2ff   : > { %v1769_v14 = vpop.permute.xlu0 %1768  ;;  %2476 = vmatprep.subr.msk.mxu1 %vm3259_vm0, %v1383_v32  ;;  %v1701_v49 = vpop.permute.xlu1 %1700 }
 0x300   : > { %2477 = vmatpush1.msk.msra.mxu1 %vm3263_vm2, %v1382_v39  ;;  %v1788_v11 = vsel %vm836_vm9, %v1769_v14, %v3842_v60 }
 0x301   : > { %2478 = vmatprep.subr.msk.mxu1 %vm3259_vm0, %v1381_v42 }
 0x302   : > { %2479 = vmatpush1.msk.msra.mxu1 %vm3263_vm2, %v1380_v58  ;;  %v331_v58 = vld [vmem:[#allocation9] sm:$0xff] }
 0x303   : > { %v1763_v59 = vpop.permute.xlu0 %1762  ;;  %2480 = vmatprep.subr.msk.mxu1 %vm3259_vm0, %v3721_v26  ;;  %v1863_v34 = vpop.permute.xlu1 %1862 }
 0x304   : > { %v1872_v28 = vsel %vm917_vm8, %v3796_v12, %v1863_v34  ;;  %2481 = vmatpush1.msk.msra.mxu1 %vm3263_vm2, %v3709_v19  ;;  %v1873_v33 = vsel %vm917_vm8, %v1863_v34, %v2721_v50  ;;  %v1869_v19 = vsel %vm917_vm8, %v3761_v36, %v2726_v15  ;;  %v1786_v2 = vsel %vm836_vm9, %v1763_v59, %v3853_v56 }
 0x305   : > { %2106 = vmatprep.subr.mxu1 %v1873_v33 }
 0x306   : > { %2107 = vmatpush2.msra.mxu1 %v1872_v28 }
 0x307   : > { %v2740_v26 = vpop.permute.xlu0 %2739  ;;  %2108 = vmatprep.subr.mxu1 %v1871_v17  ;;  %v1695_v12 = vpop.permute.xlu1 %1694 }
 0x308   : > { %2109 = vmatpush2.msra.mxu1 %v1870_v52  ;;  %v2742_v1 = vunpack.i.h.bf16 %v2740_v26  ;;  %v2741_v3 = vunpack.i.l.bf16 %v2740_v26  ;;  %v337_v26 = vld [vmem:[#allocation9 + $0x30] sm:$0xff] }
 0x309   : > { %2110 = vmatprep.subr.mxu1 %v1869_v19  ;;  %v333_v19 = vld [vmem:[#allocation9 + $0x10] sm:$0xff] }
 0x30a   : > { %2111 = vmatpush2.msra.mxu1 %v1868_v22  ;;  %v341_v22 = vld [vmem:[#allocation9 + $0x50] sm:$0xff] }
 0x30b   : > { %v1697_v9 = vpop.permute.xlu0 %1696  ;;  %2112 = vmatprep.subr.mxu1 %v1867_v8  ;;  %v1783_v53 = vpop.permute.xlu1 %1782  ;;  %v4126_v8 = vmov 0.0  }
 0x30c   : > { %v1792_v54 = vsel %vm836_vm9, %v3815_v44, %v1783_v53  ;;  %v1793_v31 = vsel %vm836_vm9, %v1783_v53, %v2731_v57  ;;  %2113 = vmatpush2.msra.mxu1 %v3725_v27  ;;  %v2737_v27 = vunpack.i.h.bf16 %v3844_v38  ;;  %v1789_v44 = vsel %vm836_vm9, %v3842_v60, %v2736_v45  ;;  %v340_v57 = vld [vmem:[#allocation9 + $0x48] sm:$0xff]  ;;  %v342_v53 = vld [vmem:[#allocation9 + $0x58] sm:$0xff] }
 0x30d   : > { %2482 = vmatprep.subr.msk.mxu1 %vm3259_vm0, %v1793_v31  ;;  %v1711_v63 = vsel %vm755_vm10, %v1697_v9, %v2742_v1  ;;  %v1710_v55 = vsel %vm755_vm10, %v1695_v12, %v1697_v9  ;;  %v336_v9 = vld [vmem:[#allocation9 + $0x28] sm:$0xff] }
 0x30e   : > { %2483 = vmatpush2.msk.msra.mxu1 %vm3263_vm2, %v1792_v54  ;;  %v1787_v30 = vsel %vm836_vm9, %v3853_v56, %v2737_v27 }
 0x30f   : > { %v1691_v35 = vpop.permute.xlu0 %1690  ;;  %2484 = vmatprep.subr.msk.mxu1 %vm3259_vm0, %v1791_v25  ;;  %v2745_v36 = vpop.permute.xlu1 %2744 }
 0x310   : > { %2485 = vmatpush2.msk.msra.mxu1 %vm3263_vm2, %v1790_v0  ;;  %v2746_v60 = vunpack.i.l.bf16 %v2745_v36  ;;  %v2747_v56 = vunpack.i.h.bf16 %v2745_v36 }
 0x311   : > { %2486 = vmatprep.subr.msk.mxu1 %vm3259_vm0, %v1789_v44 }
 0x312   : > { %2487 = vmatpush2.msk.msra.mxu1 %vm3263_vm2, %v1788_v11  ;;  %v1709_v21 = vsel %vm755_vm10, %v1691_v35, %v2746_v60 }
 0x313   : > { %v1689_v6 = vpop.permute.xlu0 %1688  ;;  %v1703_v13 = vpop.permute.xlu1 %1702  ;;  %2488 = vmatprep.subr.msk.mxu1 %vm3259_vm0, %v1787_v30 }
 0x314   : > { %v1712_v38 = vsel %vm755_vm10, %v1701_v49, %v1703_v13  ;;  %v1713_v47 = vsel %vm755_vm10, %v1703_v13, %v2741_v3  ;;  %2489 = vmatpush2.msk.msra.mxu1 %vm3263_vm2, %v1786_v2  ;;  %v1708_v16 = vsel %vm755_vm10, %v1689_v6, %v1691_v35 }
 0x315   : > { %2490 = vmatprep.subr.msk.mxu1 %vm3303_vm4, %v1713_v47 }
 0x316   : > { %2491 = vmatpush2.msk.msra.mxu1 %vm3318_vm5, %v1712_v38 }
 0x317   : > { %v1683_v18 = vpop.permute.xlu0 %1682  ;;  %v1685_v48 = vpop.permute.xlu1 %1684  ;;  %2492 = vmatprep.subr.msk.mxu1 %vm3303_vm4, %v1711_v63 }
 0x318   : > { %2493 = vmatpush2.msk.msra.mxu1 %vm3318_vm5, %v1710_v55  ;;  %v1707_v43 = vsel %vm755_vm10, %v1685_v48, %v2747_v56  ;;  %v1706_v7 = vsel %vm755_vm10, %v1683_v18, %v1685_v48  ;;  %v2758_v55 = vld [vmem:[%s3098_s30] sm:$0xff] }
 0x319   : > { %2494 = vmatprep.subr.msk.mxu1 %vm3303_vm4, %v1709_v21 }
 0x31a   : > { %2495 = vmatpush2.msk.msra.mxu1 %vm3318_vm5, %v1708_v16 }
 0x31b   : > { %v2750_v32 = vpop.permute.xlu0 %2749  ;;  %v1933_v20 = vpop.permute.xlu1 %1932  ;;  %2496 = vmatprep.subr.msk.mxu1 %vm3303_vm4, %v1707_v43 }
 0x31c   : > { %2497 = vmatpush2.msk.msra.mxu1 %vm3318_vm5, %v1706_v7  ;;  %v2752_v49 = vunpack.i.h.bf16 %v2750_v32  ;;  %v2751_v42 = vunpack.i.l.bf16 %v2750_v32  ;;  %v2759_v32 = vld [vmem:[%s3098_s30 + $0x8] sm:$0xff] }
 0x31d   : > { %2130 = vmatprep.subr.mxu1 %v3603_v41 }
 0x31e   : > { %2131 = vmatpush2.msra.mxu1 %v3593_v37 }
 0x31f   : > { %v1929_v39 = vpop.permute.xlu0 %1928  ;;  %v1927_v14 = vpop.permute.xlu1 %1926  ;;  %2132 = vmatprep.subr.mxu1 %v3573_v4 }
 0x320   : > { %2133 = vmatpush2.msra.mxu1 %v3567_v5  ;;  %v1943_v5 = vsel %vm990_vm11, %v1929_v39, %v2752_v49  ;;  %v1942_v4 = vsel %vm990_vm11, %v1927_v14, %v1929_v39 }
 0x321   : > { %2134 = vmatprep.subr.mxu1 %v3549_v24  ;;  %v335_v24 = vld [vmem:[#allocation9 + $0x20] sm:$0xff] }
 0x322   : > { %2135 = vmatpush2.msra.mxu1 %v3547_v23  ;;  %v334_v23 = vld [vmem:[#allocation9 + $0x18] sm:$0xff] }
 0x323   : > { %v1923_v50 = vpop.permute.xlu0 %1922  ;;  %v1935_v59 = vpop.permute.xlu1 %1934  ;;  %2136 = vmatprep.subr.mxu1 %v3529_v10 }
 0x324   : > { %v1944_v41 = vsel %vm990_vm11, %v1933_v20, %v1935_v59  ;;  %v1945_v37 = vsel %vm990_vm11, %v1935_v59, %v2751_v42  ;;  %2137 = vmatpush2.msra.mxu1 %v3523_v62 }
 0x325   : > { %2139 = vmatmul.mubr.f32.vlgmr.msra.gmra.mxu1 %v331_v58  ;;  %2498 = vmatprep.subr.msk.mxu0 %vm3303_vm4, %v1945_v37 }
 0x326   : > { %2506 = vmatprep.subr.msk.mxu1 %vm3303_vm4, %v1945_v37  ;;  %2499 = vmatpush1.msk.msra.mxu0 %vm3318_vm5, %v1944_v41 }
 0x327   : > { %2510 = vmatpush1.msk.msra.mxu1 %vm3318_vm5, %v1944_v41  ;;  %v1921_v10 = vpop.permute.xlu0 %1920  ;;  %2500 = vmatprep.subr.msk.mxu0 %vm3303_vm4, %v1943_v5  ;;  %v2755_v62 = vpop.permute.xlu1 %2754  ;;  %v2760_v41 = vld [vmem:[%s3098_s30 + $0x10] sm:$0xff] }
 0x328   : > { %v2756_v34 = vunpack.i.l.bf16 %v2755_v62  ;;  %2507 = vmatprep.subr.msk.mxu1 %vm3303_vm4, %v1943_v5  ;;  %2144 = vmatprep.mubr.f32.mxu1 %v335_v24  ;;  %v2757_v28 = vunpack.i.h.bf16 %v2755_v62  ;;  %v1940_v15 = vsel %vm990_vm11, %v1921_v10, %v1923_v50 }
 0x329   : > { %2501 = vmatpush1.msk.msra.mxu0 %vm3318_vm5, %v1942_v4  ;;  %2511 = vmatpush1.msk.msra.mxu1 %vm3318_vm5, %v1942_v4  ;;  %v2761_v4 = vld [vmem:[%s3098_s30 + $0x18] sm:$0xff] }
 0x32a   : > { %2145 = vmatmul.mubr.f32.gmra.mxu1 %v334_v23  ;;  %v1941_v33 = vsel %vm990_vm11, %v1923_v50, %v2756_v34 }
 0x32b   : > { %v1915_v17 = vpop.permute.xlu0 %1914  ;;  %v1917_v52 = vpop.permute.xlu1 %1916  ;;  %2502 = vmatprep.subr.msk.mxu0 %vm3303_vm4, %v1941_v33  ;;  %2508 = vmatprep.subr.msk.mxu1 %vm3303_vm4, %v1941_v33 }
 0x32c   : > { %v1938_v12 = vsel %vm990_vm11, %v1915_v17, %v1917_v52  ;;  %v1939_v61 = vsel %vm990_vm11, %v1917_v52, %v2757_v28  ;;  %2150 = vmatprep.mubr.f32.mxu1 %v338_v29  ;;  %2503 = vmatpush1.msk.msra.mxu0 %vm3318_vm5, %v1940_v15  ;;  %v2762_v29 = vld [vmem:[%s3098_s30 + $0x30] sm:$0xff]  ;;  %v2763_v52 = vld [vmem:[%s3098_s30 + $0x20] sm:$0xff] }
 0x32d   : > { %2512 = vmatpush1.msk.msra.mxu1 %vm3318_vm5, %v1940_v15  ;;  %2504 = vmatprep.subr.msk.mxu0 %vm3303_vm4, %v1939_v61 }
 0x32e   : > { %2151 = vmatmul.mubr.f32.gmra.mxu1 %v337_v26  ;;  %2509 = vmatprep.subr.msk.mxu1 %vm3303_vm4, %v1939_v61  ;;  %v2764_v61 = vld [vmem:[%s3098_s30 + $0x38] sm:$0xff] }
 0x32f   : > { %2505 = vmatpush1.msk.msra.mxu0 %vm3318_vm5, %v1938_v12  ;;  %2513 = vmatpush1.msk.msra.mxu1 %vm3318_vm5, %v1938_v12 }
 0x330   : > { %2399 = vmatmul.mubr.msk.f32.vlgmr.msra.gmra.mxu0 %vm1115_vm12, %v333_v19  ;;  %2156 = vmatprep.mubr.f32.mxu1 %v341_v22  ;;  %v2765_v22 = vld [vmem:[%s3098_s30 + $0x28] sm:$0xff] }
 0x331   : > { %2233 = vmatprep.mubr.f32.mxu0 %v4126_v8 }
 0x332   : > { %2157 = vmatmul.mubr.f32.gmra.mxu1 %v340_v57 }
 0x333   : > { %2245 = vmatprep.mubr.f32.mxu1 %v4126_v8 }
 0x334   : > { %2400 = vmatmul.mubr.msk.f32.gmra.mxu0 %vm1115_vm12, %v336_v9 }
 0x335   : > { %2239 = vmatprep.mubr.f32.mxu0 %v4126_v8 }
 0x336   : > { %2402 = vmatmul.mubr.msk.f32.vlgmr.msra.gmra.mxu1 %vm1115_vm12, %v342_v53 }
 0x338   : > { %2401 = vmatmul.mubr.msk.f32.gmra.mxu0 %vm1115_vm12, %v339_v40  ;;  %v2050_v31 = vpop.permute.xlu0 %2049  ;;  %v2045_v25 = vpop.permute.xlu1 %2044 }
 0x33c   : > { %v2060_v3 = vpop.permute.xlu0 %2059  ;;  %v2055_v63 = vpop.permute.xlu1 %2054 }
 0x3e5   : > { %v2140_v46 = vpop.f32.mrf.mxu1 }
 0x3e6   : > { %v2141_v35 = vadd.f32 %v2140_v46, %v2045_v25 }
 0x3e7   : > { %v2142_v51 = vpop.f32.mrf.mxu1 }
 0x3e8   : > { %v2143_v44 = vadd.f32 %v2142_v51, %v2045_v25 }
 0x3ea   : > { %v2146_v45 = vpop.f32.mrf.mxu1 }
 0x3eb   : > { %v2147_v2 = vadd.f32 %v2146_v45, %v2050_v31 }
 0x3ec   : > { %v2148_v54 = vpop.f32.mrf.mxu1 }
 0x3ed   : > { %v2149_v60 = vadd.f32 %v2148_v54, %v2050_v31 }
 0x3ee   : > { %v2152_v0 = vpop.f32.mrf.mxu1 }
 0x3ef   : > { %v2153_v16 = vadd.f32 %v2152_v0, %v2055_v63 }
 0x3f0   : > { %v2154_v36 = vpop.f32.mrf.mxu1  ;;  %v2229_v27 = vpop.f32.mrf.mxu0 }
 0x3f1   : > { %v2230_v11 = vadd.f32 %v2229_v27, %v2141_v35  ;;  %v2155_v42 = vadd.f32 %v2154_v36, %v2055_v63 }
 0x3f2   : > { %v2158_v30 = vpop.f32.mrf.mxu1  ;;  %v2231_v1 = vpop.f32.mrf.mxu0 }
 0x3f3   : > { %v2252_v6 = vmul.f32 0.2, %v2230_v11  ;;  %v2232_v13 = vadd.f32 %v2231_v1, %v2143_v44  ;;  %v2159_v48 = vadd.f32 %v2158_v30, %v2060_v3 }
 0x3f4   : > { %v2160_v38 = vpop.f32.mrf.mxu1  ;;  %v2235_v47 = vpop.f32.mrf.mxu0 }
 0x3f5   : > { %v2260_v18 = vadd.f32 %v2758_v55, %v2252_v6  ;;  %v2253_v56 = vmul.f32 0.2, %v2232_v13  ;;  %v2236_v21 = vadd.f32 %v2235_v47, %v2147_v2  ;;  %v2161_v58 = vadd.f32 %v2160_v38, %v2060_v3 }
 0x3f6   : > { %v2237_v43 = vpop.f32.mrf.mxu0  ;;  %v2247_v7 = vpop.f32.mrf.mxu1 }
 0x3f7   : > { %2268 = vst [vmem:[%s4026_s14] sm:$0xff] %v2260_v18  ;;  %v2261_v20 = vadd.f32 %v2759_v32, %v2253_v56  ;;  %v2254_v39 = vmul.f32 0.2, %v2236_v21  ;;  %v2238_v14 = vadd.f32 %v2237_v43, %v2149_v60  ;;  %v2248_v49 = vadd.f32 %v2247_v7, %v2159_v48 }
 0x3f8   : > { %v2241_v50 = vpop.f32.mrf.mxu0  ;;  %v2249_v59 = vpop.f32.mrf.mxu1 }
 0x3f9   : > { %2269 = vst [vmem:[%s4026_s14 + $0x8] sm:$0xff] %v2261_v20  ;;  %v2262_v37 = vadd.f32 %v2760_v41, %v2254_v39  ;;  %v2255_v24 = vmul.f32 0.2, %v2238_v14  ;;  %v2258_v5 = vmul.f32 0.2, %v2248_v49  ;;  %v2242_v10 = vadd.f32 %v2241_v50, %v2153_v16 }
 0x3fa   : > { %v2250_v62 = vadd.f32 %v2249_v59, %v2161_v58  ;;  %v2243_v23 = vpop.f32.mrf.mxu0 }
 0x3fb   : > { %2270 = vst [vmem:[%s4026_s14 + $0x10] sm:$0xff] %v2262_v37  ;;  %v2263_v34 = vadd.f32 %v2761_v4, %v2255_v24  ;;  %v2266_v28 = vadd.f32 %v2762_v29, %v2258_v5  ;;  %v2256_v33 = vmul.f32 0.2, %v2242_v10  ;;  %v2244_v15 = vadd.f32 %v2243_v23, %v2155_v42 }
 0x3fc   : > { %v2259_v17 = vmul.f32 0.2, %v2250_v62 }
 0x3fd   : > { %2271 = vst [vmem:[%s4026_s14 + $0x18] sm:$0xff] %v2263_v34  ;;  %2274 = vst [vmem:[%s4026_s14 + $0x30] sm:$0xff] %v2266_v28  ;;  %v2264_v26 = vadd.f32 %v2763_v52, %v2256_v33  ;;  %v2257_v12 = vmul.f32 0.2, %v2244_v15 }
 0x3fe   : > { %v2267_v19 = vadd.f32 %v2764_v61, %v2259_v17 }
 0x3ff   : > { %2272 = vst [vmem:[%s4026_s14 + $0x20] sm:$0xff] %v2264_v26  ;;  %v2265_v57 = vadd.f32 %v2765_v22, %v2257_v12 }
 0x400   : > { %2275 = vst [vmem:[%s4026_s14 + $0x38] sm:$0xff] %v2267_v19 }
 0x401   : > { %2273 = vst [vmem:[%s4026_s14 + $0x28] sm:$0xff] %v2265_v57 }
 0x402   : > { %2859 = shalt.err (!%p2856_p9)
}
 0x403   : > { %s2860_s30 = scalar_lea.hbm %s4048_s22, 1024  ;;  %s2864_s6 = scalar_lea.hbm %s4099_s5, 2048 }
 0x404   : > { %p2861_p13 = scmp.ne.s32.totalorder %s4048_s22, %s2860_s30  ;;  %p2865_p4 = scmp.lt.s32.totalorder %s4048_s22, %s4099_s5 }
 0x405   : > { %p2866_p8 = scmp.lt.s32.totalorder %s2864_s6, %s2860_s30 }
 0x406   : > { %p2862_p5 = pnand %p2861_p13, %p4128_p10 }
 0x407   : > { %p2867_p3 = por %p2866_p8, %p2865_p4 }
 0x408   : > { %p2863_p0 = pneg %p2862_p5 }
 0x40a   : > { %p2868_p11 = pnand %p2867_p3, %p2863_p0 }
 0x40c   : > { %2871 = shalt.err (!%p2868_p11)
}
 0x40d   : > { %s2934_s9 = smov 256  }
 0x40e   : > { %2524 = dma.vmem_to_hbm [thread:$0]  (%p4128_p10), %s4040_s29, 1024, %s4048_s22, %s2277_s26, %s2934_s9, %s2934_s9, %s2926_s8  }
 0x40f PF: > { %s2305_s17 = sand.u32 1, %s2902_s18   ;;  %p4129_p1 = scmp.ne.s32.totalorder %s4108_s25, 0 }
 0x410   : > { %p4130_p2 = scmp.ge.s32.totalorder %s2914_s21, 2  ;;  %s2306_s24 = scalar_lea.sflag [#allocation6], %s2305_s17 }
 0x412   : > { %p2538_p6 = pnand %p4130_p2, %p4129_p1 }
 0x414   : > { %p2539_p12 = pneg %p2538_p6 }
 0x416   : > { %2897 = dma.done.wait (%p2539_p12), %s2306_s24, 1024  }
 0x417   : > { %2899 = vsyncadd (%p2539_p12), %s2306_s24, 4294966272  ;;  %p19_p7 = scmp.ge.s32.totalorder %s3037_s15, 4   ;;  %s4131_s18 = smov %s2906_s19 }
 0x418   : > { %s4132_s19 = smov %s2910_s20  ;;  %s4133_s20 = smov %s3053_s27 }
 0x419   : > { %s4134_s21 = smov %s3037_s15  ;;  %21 = sbr.rel (!%p19_p7) target bundleno = 6 (0x6), region = 93 }
 0x41e   :  { %2311 = vsyncpa [#allocation5], 1 }
 0x41f   :  { %2313 = vsyncpa [#allocation5 + $0x1], 1 }
 0x420   :  { %2314 = vsyncpa [#allocation8], 1 }
 0x421   :  { %2315 = vsyncpa [#allocation6], 1 }
 0x422   :  { %2317 = vsyncpa [#allocation6 + $0x1], 1 }

</bundles_post_ra>
